<compile_context>
chip_gen: v5e
topology: v5e:2x2
jax: 0.10.0
libtpu: 0.0.40
codegen_flags: <defaults>
</compile_context>

<pallas_src>
import jax
import jax.numpy as jnp
from jax.experimental import pallas as pl
from jax.experimental.pallas import tpu as pltpu


HP = 128   # hidden channels padded to a full lane group -> lane-dense stores
KP = 128   # packed/padded feature ("K") dim of the fused first-stage matmul


# ------------------------------ Fused kernel ------------------------------- #
def _encoder_kernel(a1_ref, a2_ref, x_ref, w_ref, prm_ref, out_ref,
                    acc1_ref, acc2_ref):
    k = pl.program_id(1)
    tk = a1_ref.shape[1]                      # K (source-node) tile size

    @pl.when(k == 0)
    def _():
        acc1_ref[...] = jnp.zeros_like(acc1_ref)
        acc2_ref[...] = jnp.zeros_like(acc2_ref)

    # Fused stage 1: XW tile computed on the fly from the resident X slab.
    #   XW[k] = X[k*TK : (k+1)*TK, :] @ blockdiag(W1, W2)     (TK, 2*HP)
    # Extra MXU work is ~128/TM of the A matmuls (negligible, HBM-bound).
    align = tk & (-tk)                        # largest power-of-2 divisor of tk
    row0 = pl.multiple_of(k * tk, align)
    x_tile = x_ref[pl.ds(row0, tk), :]                       # (TK, KP) bf16
    xw = jnp.dot(x_tile, w_ref[...],
                 preferred_element_type=jnp.float32).astype(jnp.bfloat16)

    # Lanes [0:128) of xw hold X1@W1, lanes [128:256) hold X2@W2; the split is
    # on a 128-lane-group boundary so it is a zero-cost vreg selection.
    acc1_ref[...] += jnp.dot(a1_ref[...], xw[:, :HP],
                             preferred_element_type=jnp.float32)
    acc2_ref[...] += jnp.dot(a2_ref[...], xw[:, HP:],
                             preferred_element_type=jnp.float32)

    @pl.when(k == pl.num_programs(1) - 1)
    def _():
        prm = prm_ref[...]                    # (8, HP): rows = b1, b2, s1, s2
        h1 = acc1_ref[...] + prm[0:1, :]
        h1 = jnp.where(h1 >= 0.0, h1, prm[2:3, :] * h1)      # per-channel PReLU
        h2 = acc2_ref[...] + prm[1:2, :]
        h2 = jnp.where(h2 >= 0.0, h2, prm[3:4, :] * h2)
        # NOTE: padded rows [n:Np) get bias+PReLU(bias); sliced off by caller.
        out_ref[...] = (h1 + h2) * 0.5


def _encoder_pallas(a1, a2, x_packed, w_packed, prm, tm, tk):
    np_ = a1.shape[0]
    kp = x_packed.shape[1]
    grid = (np_ // tm, np_ // tk)
    return pl.pallas_call(
        _encoder_kernel,
        out_shape=jax.ShapeDtypeStruct((np_, HP), jnp.float32),
        grid_spec=pltpu.PrefetchScalarGridSpec(
            num_scalar_prefetch=0,
            grid=grid,
            in_specs=[
                pl.BlockSpec((tm, tk), lambda i, k: (i, k)),        # A1 tile
                pl.BlockSpec((tm, tk), lambda i, k: (i, k)),        # A2 tile
                # Constant-index full-array blocks: DMA'd once, stay resident.
                pl.BlockSpec((np_, kp), lambda i, k: (0, 0)),       # X slab
                pl.BlockSpec((kp, 2 * HP), lambda i, k: (0, 0)),    # W packed
                pl.BlockSpec((8, HP), lambda i, k: (0, 0)),         # b1,b2,s1,s2
            ],
            out_specs=pl.BlockSpec((tm, HP), lambda i, k: (i, 0)),
            scratch_shapes=[pltpu.VMEM((tm, HP), jnp.float32),
                            pltpu.VMEM((tm, HP), jnp.float32)]),
        compiler_params=pltpu.CompilerParams(
            dimension_semantics=("parallel", "arbitrary")),
    )(a1, a2, x_packed, w_packed, prm)


# ------------------------------ Tiling choice ------------------------------ #
def _round_up(x, m):
    return ((x + m - 1) // m) * m


def _choose_tiling(n):
    """Returns (padded_nodes, TM, TK)."""
    np_small = _round_up(n, 16)
    if np_small <= 1024:
        # Small-N fast path: single K step; two row tiles so both v7x
        # TensorCores get work (harmless on single-TC v5e/v6e).
        tm = max(8, np_small // 2)
        return np_small, tm, np_small
    # Large-N path: 512-wide tiles (~85% of HBM roofline), modest padding.
    np_ = _round_up(n, 256)
    tm = 512 if np_ % 512 == 0 else 256
    return np_, tm, tm


# ------------------------------ JAX glue ----------------------------------- #
def gcn_norm_dense(edge_index, edge_weight, num_nodes, padded_nodes):
    """Dense normalized adjacency A_hat[dst, src] with self loops (PyG gcn_norm,
    add_self_loops=True, improved=False), zero-padded to (padded, padded)."""
    src = edge_index[0]
    dst = edge_index[1]
    loop = jnp.arange(num_nodes, dtype=edge_index.dtype)
    src = jnp.concatenate([src, loop])
    dst = jnp.concatenate([dst, loop])
    ew = jnp.concatenate(
        [edge_weight.astype(jnp.float32), jnp.ones((num_nodes,), jnp.float32)])

    deg = jnp.zeros((num_nodes,), jnp.float32).at[dst].add(ew)
    dinv = jnp.where(deg > 0.0, 1.0 / jnp.sqrt(deg), 0.0)
    norm = dinv[src] * ew * dinv[dst]

    a_hat = jnp.zeros((padded_nodes, padded_nodes), jnp.float32)
    return a_hat.at[dst, src].add(norm)


def _pack_params(b1, b2, s1, s2, h):
    prm = jnp.zeros((8, HP), jnp.float32)
    prm = prm.at[0, :h].set(jnp.asarray(b1, jnp.float32))
    prm = prm.at[1, :h].set(jnp.asarray(b2, jnp.float32))
    prm = prm.at[2, :h].set(jnp.asarray(s1, jnp.float32))
    prm = prm.at[3, :h].set(jnp.asarray(s2, jnp.float32))
    return prm


def encoder_forward(params, x1, edge_index1, edge_weight1,
                    x2, edge_index2, edge_weight2):
    n, c1 = x1.shape
    c2 = x2.shape[1]
    h = params["w1"].shape[1]
    assert h <= HP and c1 + c2 <= KP
    np_, tm, tk = _choose_tiling(n)

    # Dense normalized adjacencies; bf16 halves HBM traffic and feeds the MXU.
    a1 = gcn_norm_dense(edge_index1, edge_weight1, n, np_).astype(jnp.bfloat16)
    a2 = gcn_norm_dense(edge_index2, edge_weight2, n, np_).astype(jnp.bfloat16)

    # Packed first-stage operands:  X_packed = [X1 | X2] zero-padded to 128
    # features,  W_packed = blockdiag(W1, W2) with each hidden dim padded to
    # a 128-lane group.
    x_packed = jnp.zeros((np_, KP), jnp.float32)
    x_packed = x_packed.at[:n, :c1].set(x1.astype(jnp.float32))
    x_packed = x_packed.at[:n, c1:c1 + c2].set(x2.astype(jnp.float32))
    w_packed = jnp.zeros((KP, 2 * HP), jnp.float32)
    w_packed = w_packed.at[:c1, :h].set(params["w1"])
    w_packed = w_packed.at[c1:c1 + c2, HP:HP + h].set(params["w2"])
    prm = _pack_params(params["b1"], params["b2"], params["p1"], params["p2"], h)

    out = _encoder_pallas(a1, a2,
                          x_packed.astype(jnp.bfloat16),
                          w_packed.astype(jnp.bfloat16),
                          prm, tm, tk)
    return out[:n, :h]


def reference_forward(params, x1, edge_index1, edge_weight1,
                      x2, edge_index2, edge_weight2):
    """Pure-JAX f32 reference (same math) for a sanity check."""
    n = x1.shape[0]
    a1 = gcn_norm_dense(edge_index1, edge_weight1, n, n)
    a2 = gcn_norm_dense(edge_index2, edge_weight2, n, n)
    b1 = jnp.asarray(params["b1"], jnp.float32).reshape(1, -1)
    b2 = jnp.asarray(params["b2"], jnp.float32).reshape(1, -1)
    p1 = jnp.asarray(params["p1"], jnp.float32).reshape(1, -1)
    p2 = jnp.asarray(params["p2"], jnp.float32).reshape(1, -1)
    h1 = a1 @ (x1 @ params["w1"]) + b1
    h1 = jnp.where(h1 >= 0.0, h1, p1 * h1)
    h2 = a2 @ (x2 @ params["w2"]) + b2
    h2 = jnp.where(h2 >= 0.0, h2, p2 * h2)
    return (h1 + h2) * 0.5


# ------------------------------- Main -------------------------------------- #
if __name__ == "__main__":
    key = jax.random.PRNGKey(0)
    N = 300            # nodes (same for both graphs; outputs are averaged)
    C1, C2 = 8, 12     # in_channels_1, in_channels_2
    H = 32             # hidden_channels
    E1, E2 = 900, 900  # edge counts

    ks = jax.random.split(key, 12)

    # Deterministic parameter init (glorot-ish weights, PReLU default 0.25).
    w1 = jax.random.normal(ks[0], (C1, H), jnp.float32) * jnp.sqrt(2.0 / (C1 + H))
    w2 = jax.random.normal(ks[1], (C2, H), jnp.float32) * jnp.sqrt(2.0 / (C2 + H))
    b1 = 0.1 * jax.random.normal(ks[8], (H,), jnp.float32)
    b2 = 0.1 * jax.random.normal(ks[9], (H,), jnp.float32)
    p1 = jnp.full((H,), 0.25, jnp.float32)
    p2 = jnp.full((H,), 0.25, jnp.float32)
    params = {"w1": w1, "b1": b1, "p1": p1, "w2": w2, "b2": b2, "p2": p2}

    # Inputs.
    x1 = jax.random.normal(ks[2], (N, C1), jnp.float32)
    x2 = jax.random.normal(ks[3], (N, C2), jnp.float32)
    edge_index1 = jax.random.randint(ks[4], (2, E1), 0, N, dtype=jnp.int32)
    edge_index2 = jax.random.randint(ks[5], (2, E2), 0, N, dtype=jnp.int32)
    edge_weight1 = jax.random.uniform(ks[6], (E1,), jnp.float32, 0.1, 1.0)
    edge_weight2 = jax.random.uniform(ks[7], (E2,), jnp.float32, 0.1, 1.0)

    fwd = jax.jit(encoder_forward)
    out = fwd(params, x1, edge_index1, edge_weight1,
              x2, edge_index2, edge_weight2)
    out = jax.block_until_ready(out)

    ref = reference_forward(params, x1, edge_index1, edge_weight1,
                            x2, edge_index2, edge_weight2)
    assert out.shape == (N, H)
    # bf16 MXU inputs (A_hat, X, W) with f32 accumulation -> relaxed tolerance.
    assert jnp.allclose(out, ref, atol=5e-2, rtol=5e-2), (
        float(jnp.max(jnp.abs(out - ref))))

    print("KERNEL_OK")
</pallas_src>

<mosaic_0001>
module attributes {stable_mosaic.version = 11 : i64} {
  func.func @_encoder_kernel(%arg0: i32, %arg1: i32, %arg2: memref<152x304xbf16, #tpu.memory_space<vmem>>, %arg3: memref<152x304xbf16, #tpu.memory_space<vmem>>, %arg4: memref<304x128xbf16, #tpu.memory_space<vmem>>, %arg5: memref<128x256xbf16, #tpu.memory_space<vmem>>, %arg6: memref<8x128xf32, #tpu.memory_space<vmem>>, %arg7: memref<152x128xf32, #tpu.memory_space<vmem>>, %arg8: memref<152x128xf32, #tpu.memory_space<vmem>>, %arg9: memref<152x128xf32, #tpu.memory_space<vmem>>) attributes {dimension_semantics = [#tpu.dimension_semantics<parallel>, #tpu.dimension_semantics<arbitrary>], iteration_bounds = array<i64: 2, 1>, scalar_prefetch = 0 : i64, scratch_operands = 2 : i64, tpu.core_type = #tpu.core_type<tc>, window_params = [{transform_indices = @transform_0, window_bounds = array<i64: 152, 304>}, {transform_indices = @transform_1, window_bounds = array<i64: 152, 304>}, {pipeline_mode = #tpu.pipeline_mode<synchronous>, transform_indices = @transform_2, window_bounds = array<i64: 304, 128>}, {pipeline_mode = #tpu.pipeline_mode<synchronous>, transform_indices = @transform_3, window_bounds = array<i64: 128, 256>}, {pipeline_mode = #tpu.pipeline_mode<synchronous>, transform_indices = @transform_4, window_bounds = array<i64: 8, 128>}, {transform_indices = @transform_5, window_bounds = array<i64: 152, 128>}]} {
    %c0_i32 = arith.constant 0 : i32
    %0 = arith.cmpi eq, %arg1, %c0_i32 : i32
    %1 = arith.extui %0 : i1 to i32
    %c0_i32_0 = arith.constant 0 : i32
    %2 = arith.cmpi ne, %1, %c0_i32_0 : i32
    scf.if %2 {
      %cst_19 = arith.constant 0.000000e+00 : f32
      %25 = vector.broadcast %cst_19 : f32 to vector<152x128xf32>
      %c0_20 = arith.constant 0 : index
      %c0_21 = arith.constant 0 : index
      %26 = vector.load %arg8[%c0_20, %c0_21] : memref<152x128xf32, #tpu.memory_space<vmem>>, vector<152x128xf32>
      tpu.vector_store %arg8[%c0_20, %c0_21], %25 {strides = array<i32>} : memref<152x128xf32, #tpu.memory_space<vmem>>, vector<152x128xf32>,
      %cst_22 = arith.constant 0.000000e+00 : f32
      %27 = vector.broadcast %cst_22 : f32 to vector<152x128xf32>
      %c0_23 = arith.constant 0 : index
      %c0_24 = arith.constant 0 : index
      %28 = vector.load %arg9[%c0_23, %c0_24] : memref<152x128xf32, #tpu.memory_space<vmem>>, vector<152x128xf32>
      tpu.vector_store %arg9[%c0_23, %c0_24], %27 {strides = array<i32>} : memref<152x128xf32, #tpu.memory_space<vmem>>, vector<152x128xf32>,
    } else {
    }
    %c304_i32 = arith.constant 304 : i32
    %3 = arith.muli %arg1, %c304_i32 : i32
    %4 = tpu.assume_multiple %3, 16 : i32
    %5 = arith.index_cast %4 : i32 to index
    %c0 = arith.constant 0 : index
    %6 = vector.load %arg4[%5, %c0] : memref<304x128xbf16, #tpu.memory_space<vmem>>, vector<304x128xbf16>
    %c0_1 = arith.constant 0 : index
    %c0_2 = arith.constant 0 : index
    %7 = vector.load %arg5[%c0_1, %c0_2] : memref<128x256xbf16, #tpu.memory_space<vmem>>, vector<128x256xbf16>
    %cst = arith.constant dense<0.000000e+00> : vector<304x256xf32>
    %8 = tpu.matmul %6, %7, %cst {dimension_numbers = #tpu.dot_dimension_numbers<[1], [0], [0], [1], [0, 0, 1, 1], [], []>} : vector<304x128xbf16>, vector<128x256xbf16>, vector<304x256xf32> -> vector<304x256xf32>
    %9 = arith.truncf %8 : vector<304x256xf32> to vector<304x256xbf16>
    %c0_3 = arith.constant 0 : index
    %c0_4 = arith.constant 0 : index
    %10 = vector.load %arg8[%c0_3, %c0_4] : memref<152x128xf32, #tpu.memory_space<vmem>>, vector<152x128xf32>
    %c0_5 = arith.constant 0 : index
    %c0_6 = arith.constant 0 : index
    %11 = vector.load %arg2[%c0_5, %c0_6] : memref<152x304xbf16, #tpu.memory_space<vmem>>, vector<152x304xbf16>
    %12 = vector.extract_strided_slice %9 {offsets = [0, 0], sizes = [304, 128], strides = [1, 1]} : vector<304x256xbf16> to vector<304x128xbf16>
    %cst_7 = arith.constant dense<0.000000e+00> : vector<152x128xf32>
    %13 = tpu.matmul %11, %12, %cst_7 {dimension_numbers = #tpu.dot_dimension_numbers<[1], [0], [0], [1], [0, 0, 1, 1], [], []>} : vector<152x304xbf16>, vector<304x128xbf16>, vector<152x128xf32> -> vector<152x128xf32>
    %14 = arith.addf %10, %13 : vector<152x128xf32>
    %c0_8 = arith.constant 0 : index
    %c0_9 = arith.constant 0 : index
    %15 = vector.load %arg8[%c0_8, %c0_9] : memref<152x128xf32, #tpu.memory_space<vmem>>, vector<152x128xf32>
    tpu.vector_store %arg8[%c0_8, %c0_9], %14 {strides = array<i32>} : memref<152x128xf32, #tpu.memory_space<vmem>>, vector<152x128xf32>,
    %c0_10 = arith.constant 0 : index
    %c0_11 = arith.constant 0 : index
    %16 = vector.load %arg9[%c0_10, %c0_11] : memref<152x128xf32, #tpu.memory_space<vmem>>, vector<152x128xf32>
    %c0_12 = arith.constant 0 : index
    %c0_13 = arith.constant 0 : index
    %17 = vector.load %arg3[%c0_12, %c0_13] : memref<152x304xbf16, #tpu.memory_space<vmem>>, vector<152x304xbf16>
    %18 = vector.extract_strided_slice %9 {offsets = [0, 128], sizes = [304, 128], strides = [1, 1]} : vector<304x256xbf16> to vector<304x128xbf16>
    %cst_14 = arith.constant dense<0.000000e+00> : vector<152x128xf32>
    %19 = tpu.matmul %17, %18, %cst_14 {dimension_numbers = #tpu.dot_dimension_numbers<[1], [0], [0], [1], [0, 0, 1, 1], [], []>} : vector<152x304xbf16>, vector<304x128xbf16>, vector<152x128xf32> -> vector<152x128xf32>
    %20 = arith.addf %16, %19 : vector<152x128xf32>
    %c0_15 = arith.constant 0 : index
    %c0_16 = arith.constant 0 : index
    %21 = vector.load %arg9[%c0_15, %c0_16] : memref<152x128xf32, #tpu.memory_space<vmem>>, vector<152x128xf32>
    tpu.vector_store %arg9[%c0_15, %c0_16], %20 {strides = array<i32>} : memref<152x128xf32, #tpu.memory_space<vmem>>, vector<152x128xf32>,
    %c0_i32_17 = arith.constant 0 : i32
    %22 = arith.cmpi eq, %arg1, %c0_i32_17 : i32
    %23 = arith.extui %22 : i1 to i32
    %c0_i32_18 = arith.constant 0 : i32
    %24 = arith.cmpi ne, %23, %c0_i32_18 : i32
    scf.if %24 {
      %c0_19 = arith.constant 0 : index
      %c0_20 = arith.constant 0 : index
      %25 = vector.load %arg6[%c0_19, %c0_20] : memref<8x128xf32, #tpu.memory_space<vmem>>, vector<8x128xf32>
      %c0_21 = arith.constant 0 : index
      %c0_22 = arith.constant 0 : index
      %26 = vector.load %arg8[%c0_21, %c0_22] : memref<152x128xf32, #tpu.memory_space<vmem>>, vector<152x128xf32>
      %27 = vector.extract_strided_slice %25 {offsets = [0, 0], sizes = [1, 128], strides = [1, 1]} : vector<8x128xf32> to vector<1x128xf32>
      %28 = vector.broadcast %27 : vector<1x128xf32> to vector<152x128xf32>
      %29 = arith.addf %26, %28 : vector<152x128xf32>
      %cst_23 = arith.constant 0.000000e+00 : f32
      %30 = vector.broadcast %cst_23 : f32 to vector<152x128xf32>
      %31 = arith.cmpf oge, %29, %30 : vector<152x128xf32>
      %32 = vector.extract_strided_slice %25 {offsets = [2, 0], sizes = [1, 128], strides = [1, 1]} : vector<8x128xf32> to vector<1x128xf32>
      %33 = vector.broadcast %32 : vector<1x128xf32> to vector<152x128xf32>
      %34 = arith.mulf %33, %29 : vector<152x128xf32>
      %35 = arith.select %31, %29, %34 : vector<152x128xi1>, vector<152x128xf32>
      %c0_24 = arith.constant 0 : index
      %c0_25 = arith.constant 0 : index
      %36 = vector.load %arg9[%c0_24, %c0_25] : memref<152x128xf32, #tpu.memory_space<vmem>>, vector<152x128xf32>
      %37 = vector.extract_strided_slice %25 {offsets = [1, 0], sizes = [1, 128], strides = [1, 1]} : vector<8x128xf32> to vector<1x128xf32>
      %38 = vector.broadcast %37 : vector<1x128xf32> to vector<152x128xf32>
      %39 = arith.addf %36, %38 : vector<152x128xf32>
      %cst_26 = arith.constant 0.000000e+00 : f32
      %40 = vector.broadcast %cst_26 : f32 to vector<152x128xf32>
      %41 = arith.cmpf oge, %39, %40 : vector<152x128xf32>
      %42 = vector.extract_strided_slice %25 {offsets = [3, 0], sizes = [1, 128], strides = [1, 1]} : vector<8x128xf32> to vector<1x128xf32>
      %43 = vector.broadcast %42 : vector<1x128xf32> to vector<152x128xf32>
      %44 = arith.mulf %43, %39 : vector<152x128xf32>
      %45 = arith.select %41, %39, %44 : vector<152x128xi1>, vector<152x128xf32>
      %46 = arith.addf %35, %45 : vector<152x128xf32>
      %cst_27 = arith.constant 5.000000e-01 : f32
      %47 = vector.broadcast %cst_27 : f32 to vector<152x128xf32>
      %48 = arith.mulf %46, %47 : vector<152x128xf32>
      %c0_28 = arith.constant 0 : index
      %c0_29 = arith.constant 0 : index
      %49 = vector.load %arg7[%c0_28, %c0_29] : memref<152x128xf32, #tpu.memory_space<vmem>>, vector<152x128xf32>
      tpu.vector_store %arg7[%c0_28, %c0_29], %48 {strides = array<i32>} : memref<152x128xf32, #tpu.memory_space<vmem>>, vector<152x128xf32>,
    } else {
    }
    return
  }
  func.func @transform_0(%arg0: i32, %arg1: i32) -> (i32, i32) {
    %c0_i32 = arith.constant 0 : i32
    return %arg0, %arg1 : i32, i32
  }
  func.func @transform_1(%arg0: i32, %arg1: i32) -> (i32, i32) {
    %c0_i32 = arith.constant 0 : i32
    return %arg0, %arg1 : i32, i32
  }
  func.func @transform_2(%arg0: i32, %arg1: i32) -> (i32, i32) {
    %c0_i32 = arith.constant 0 : i32
    %c0_i32_0 = arith.constant 0 : i32
    %c0_i32_1 = arith.constant 0 : i32
    return %c0_i32, %c0_i32_0 : i32, i32
  }
  func.func @transform_3(%arg0: i32, %arg1: i32) -> (i32, i32) {
    %c0_i32 = arith.constant 0 : i32
    %c0_i32_0 = arith.constant 0 : i32
    %c0_i32_1 = arith.constant 0 : i32
    return %c0_i32, %c0_i32_0 : i32, i32
  }
  func.func @transform_4(%arg0: i32, %arg1: i32) -> (i32, i32) {
    %c0_i32 = arith.constant 0 : i32
    %c0_i32_0 = arith.constant 0 : i32
    %c0_i32_1 = arith.constant 0 : i32
    return %c0_i32, %c0_i32_0 : i32, i32
  }
  func.func @transform_5(%arg0: i32, %arg1: i32) -> (i32, i32) {
    %c0_i32 = arith.constant 0 : i32
    %c0_i32_0 = arith.constant 0 : i32
    return %arg0, %c0_i32 : i32, i32
  }
}

</mosaic_0001>

<bundles_post_ra>
// kernel: encoder_forward.1
= control target key start
LH: loop header
LB: loop body
LE: loop exit
PB: predicated region body
PF: predicated region fallthrough
CT: control target
= control target key end

     0   :  { %s2837_s18 = smov 0   ;;  %s2839_s19 = smov 0   ;;  %s3653_s0 = inlined_call_operand.vmem [shape: bf16[304,304], index: 0, kind: input, shape index: {}]   ;;  %s3654_s1 = inlined_call_operand.vmem [shape: bf16[304,304], index: 1, kind: input, shape index: {}]   ;;  %s3655_s2 = inlined_call_operand.vmem [shape: bf16[304,128], index: 2, kind: input, shape index: {}]   ;;  %s3656_s3 = inlined_call_operand.vmem [shape: bf16[128,256], index: 3, kind: input, shape index: {}]   ;;  %s3657_s4 = inlined_call_operand.vmem [shape: f32[8,128], index: 4, kind: input, shape index: {}]   ;;  %s3658_s5 = inlined_call_operand.vmem [shape: f32[304,128], index: 5, kind: output, shape index: {}]  }
   0x1   :  { %s2841_s20 = smov 0  }
   0x2 LB: > { %s27_s21 = sadd.s32 1, %s2801_s19  ;;  %p2271_p0 = scmp.ge.s32.totalorder %s2805_s20, 1  ;;  %s2805_s20 = sphi %s2841_s20, %s15_s20   ;;  %s2801_s19 = sphi %s2839_s19, %s3660_s19   ;;  %s2797_s18 = sphi %s2837_s18, %s3659_s18  }
   0x3   : > { %p29_p1 = scmp.ge.s32.totalorder %s27_s21, 2  ;;  %p227_p2 = scmp.lt.s32.totalorder %s2805_s20, 3 }
   0x5   : > { %s3662_s21 = smov (%p29_p1, %s27_s21), 0  ;;  %p228_p3 = pnand %p2271_p0, %p227_p2 }
   0x6   : > { %s270_s15 = smul.u32 (!%p228_p3), 19, %s2797_s18 }
   0x7   : > { %231 = sbr.rel (%p228_p3) target bundleno = 888 (0x378), region = 40 }
   0x8   : > { %p272_p4 = scmp.lt.s32.totalorder (!%p228_p3), %s270_s15, 37 }
   0xc   : > { %v2409_v0 = vld [vmem:[%s3656_s3 + $0x70] sm:$0xf]  ;;  %v2687_v1 = vld [vmem:[%s3656_s3 + $0x74] sm:$0xf0]  ;;  %v2686_v2 = vld [vmem:[%s3656_s3 + $0x74] sm:$0xf] }
   0xd   : > { %v2410_v3 = vor.u32 %v2687_v1, %v2409_v0  ;;  %v2411_v4 = vld [vmem:[%s3656_s3 + $0x78] sm:$0xf0]  ;;  %v2401_v5 = vld [vmem:[%s3656_s3 + $0x60] sm:$0xf]  ;;  %v2685_v6 = vld [vmem:[%s3656_s3 + $0x64] sm:$0xf0] }
   0xe   : > { %v2414_v7 = vor.u32 %v2686_v2, %v2411_v4  ;;  %v2684_v8 = vld [vmem:[%s3656_s3 + $0x64] sm:$0xf]  ;;  %v2403_v9 = vld [vmem:[%s3656_s3 + $0x68] sm:$0xf0]  ;;  %v2402_v10 = vor.u32 %v2685_v6, %v2401_v5  ;;  %v2393_v12 = vld [vmem:[%s3656_s3 + $0x50] sm:$0xf] }
   0xf   : > { %596 = vmatpush.bf16.msra.mxu0 %v2410_v3  ;;  %2742 = vmatpush.bf16.msra.mxu2 %v2410_v3  ;;  %v2406_v11 = vor.u32 %v2684_v8, %v2403_v9  ;;  %v2683_v13 = vld [vmem:[%s3656_s3 + $0x54] sm:$0xf0]  ;;  %v2682_v14 = vld [vmem:[%s3656_s3 + $0x54] sm:$0xf]  ;;  %v2395_v15 = vld [vmem:[%s3656_s3 + $0x58] sm:$0xf0] }
  0x10   : > { %700 = vmatpush.bf16.msra.mxu1 %v2414_v7  ;;  %2750 = vmatpush.bf16.msra.mxu3 %v2414_v7  ;;  %v2394_v16 = vor.u32 %v2683_v13, %v2393_v12  ;;  %v2398_v17 = vor.u32 %v2682_v14, %v2395_v15  ;;  %v2385_v18 = vld [vmem:[%s3656_s3 + $0x40] sm:$0xf]  ;;  %v2681_v19 = vld [vmem:[%s3656_s3 + $0x44] sm:$0xf0]  ;;  %v2680_v20 = vld [vmem:[%s3656_s3 + $0x44] sm:$0xf] }
  0x11   : > { %v2387_v21 = vld [vmem:[%s3656_s3 + $0x48] sm:$0xf0]  ;;  %v2386_v22 = vor.u32 %v2681_v19, %v2385_v18  ;;  %v2377_v24 = vld [vmem:[%s3656_s3 + $0x30] sm:$0xf]  ;;  %v2679_v25 = vld [vmem:[%s3656_s3 + $0x34] sm:$0xf0] }
  0x12   : > { %v2390_v23 = vor.u32 %v2680_v20, %v2387_v21  ;;  %v2678_v26 = vld [vmem:[%s3656_s3 + $0x34] sm:$0xf]  ;;  %v2379_v27 = vld [vmem:[%s3656_s3 + $0x38] sm:$0xf0]  ;;  %v2378_v28 = vor.u32 %v2679_v25, %v2377_v24  ;;  %v2369_v30 = vld [vmem:[%s3656_s3 + $0x20] sm:$0xf] }
  0x13   : > { %597 = vmatpush.bf16.msra.mxu0 %v2402_v10  ;;  %2743 = vmatpush.bf16.msra.mxu2 %v2402_v10  ;;  %v2382_v29 = vor.u32 %v2678_v26, %v2379_v27  ;;  %v2677_v31 = vld [vmem:[%s3656_s3 + $0x24] sm:$0xf0]  ;;  %v2676_v32 = vld [vmem:[%s3656_s3 + $0x24] sm:$0xf]  ;;  %v2371_v33 = vld [vmem:[%s3656_s3 + $0x28] sm:$0xf0] }
  0x14   : > { %701 = vmatpush.bf16.msra.mxu1 %v2406_v11  ;;  %2751 = vmatpush.bf16.msra.mxu3 %v2406_v11  ;;  %v2370_v34 = vor.u32 %v2677_v31, %v2369_v30  ;;  %v2374_v35 = vor.u32 %v2676_v32, %v2371_v33  ;;  %v2361_v36 = vld [vmem:[%s3656_s3 + $0x10] sm:$0xf]  ;;  %v2675_v37 = vld [vmem:[%s3656_s3 + $0x14] sm:$0xf0]  ;;  %v2674_v38 = vld [vmem:[%s3656_s3 + $0x14] sm:$0xf] }
  0x15   : > { %v2363_v39 = vld [vmem:[%s3656_s3 + $0x18] sm:$0xf0]  ;;  %v2362_v40 = vor.u32 %v2675_v37, %v2361_v36  ;;  %v2353_v42 = vld [vmem:[%s3656_s3] sm:$0xf]  ;;  %v2673_v43 = vld [vmem:[%s3656_s3 + $0x4] sm:$0xf0] }
  0x16   : > { %v2366_v41 = vor.u32 %v2674_v38, %v2363_v39  ;;  %v2672_v44 = vld [vmem:[%s3656_s3 + $0x4] sm:$0xf]  ;;  %v2355_v45 = vld [vmem:[%s3656_s3 + $0x8] sm:$0xf0]  ;;  %v2354_v46 = vor.u32 %v2673_v43, %v2353_v42  ;;  %v2655_v50 = vld [vmem:[%s3655_s2 + $0x10] sm:$0xff]  ;;  %s3664_s15 = smov (!%p272_p4, %s270_s15), 37 }
  0x17   : > { %598 = vmatpush.bf16.msra.mxu0 %v2394_v16  ;;  %2744 = vmatpush.bf16.msra.mxu2 %v2394_v16  ;;  %v2358_v47 = vor.u32 %v2672_v44, %v2355_v45  ;;  %v2653_v48 = vld [vmem:[%s3655_s2] sm:$0xff]  ;;  %v2654_v49 = vld [vmem:[%s3655_s2 + $0x8] sm:$0xff]  ;;  %v2656_v51 = vld [vmem:[%s3655_s2 + $0x18] sm:$0xff]  ;;  %s2758_s18 = smul.u32 12, %s3664_s15  ;;  %vm1158_vm0 = vcmask 392192   ;;  %s2274_s28 = sshll.u32 %s3664_s15, 3 }
  0x18   : > { %702 = vmatpush.bf16.msra.mxu1 %v2398_v17  ;;  %2752 = vmatpush.bf16.msra.mxu3 %v2398_v17  ;;  %v2657_v52 = vld [vmem:[%s3655_s2 + $0x20] sm:$0xff]  ;;  %v2668_v53 = vld [vmem:[%s3655_s2 + $0x78] sm:$0xff]  ;;  %v2658_v54 = vld [vmem:[%s3655_s2 + $0x28] sm:$0xff]  ;;  %s3436_s6 = scalar_lea.vmem %s3658_s5, %s2274_s28 }
  0x19   : > { %v2669_v55 = vld [vmem:[%s3655_s2 + $0x80] sm:$0xff]  ;;  %v2659_v56 = vld [vmem:[%s3655_s2 + $0x30] sm:$0xff]  ;;  %v2670_v57 = vld [vmem:[%s3655_s2 + $0x88] sm:$0xff]  ;;  %s3078_s22 = scalar_lea.vmem %s3653_s0, %s2758_s18  ;;  %s3200_s25 = scalar_lea.vmem %s3654_s1, %s2758_s18 }
  0x1a   : > { %v2660_v58 = vld [vmem:[%s3655_s2 + $0x38] sm:$0xff]  ;;  %v2671_v59 = vld [vmem:[%s3655_s2 + $0x90] sm:$0xff]  ;;  %v2661_v60 = vld [vmem:[%s3655_s2 + $0x40] sm:$0xff] }
  0x1b   : > { %599 = vmatpush.bf16.msra.mxu0 %v2386_v22  ;;  %2745 = vmatpush.bf16.msra.mxu2 %v2386_v22  ;;  %v2662_v9 = vld [vmem:[%s3655_s2 + $0x48] sm:$0xff]  ;;  %v2663_v22 = vld [vmem:[%s3655_s2 + $0x50] sm:$0xff]  ;;  %v2665_v45 = vld [vmem:[%s3655_s2 + $0x60] sm:$0xff] }
  0x1c   : > { %703 = vmatpush.bf16.msra.mxu1 %v2390_v23  ;;  %2753 = vmatpush.bf16.msra.mxu3 %v2390_v23 }
  0x1f   : > { %600 = vmatpush.bf16.msra.mxu0 %v2378_v28  ;;  %2746 = vmatpush.bf16.msra.mxu2 %v2378_v28 }
  0x20   : > { %704 = vmatpush.bf16.msra.mxu1 %v2382_v29  ;;  %2754 = vmatpush.bf16.msra.mxu3 %v2382_v29 }
  0x23   : > { %601 = vmatpush.bf16.msra.mxu0 %v2370_v34  ;;  %2747 = vmatpush.bf16.msra.mxu2 %v2370_v34 }
  0x24   : > { %705 = vmatpush.bf16.msra.mxu1 %v2374_v35  ;;  %2755 = vmatpush.bf16.msra.mxu3 %v2374_v35  ;;  %v2664_v35 = vld [vmem:[%s3655_s2 + $0x58] sm:$0xff] }
  0x27   : > { %602 = vmatpush.bf16.msra.mxu0 %v2362_v40  ;;  %2748 = vmatpush.bf16.msra.mxu2 %v2362_v40 }
  0x28   : > { %706 = vmatpush.bf16.msra.mxu1 %v2366_v41  ;;  %2756 = vmatpush.bf16.msra.mxu3 %v2366_v41 }
  0x2b   : > { %603 = vmatpush.bf16.msra.mxu0 %v2354_v46  ;;  %2749 = vmatpush.bf16.msra.mxu2 %v2354_v46 }
  0x2c   : > { %707 = vmatpush.bf16.msra.mxu1 %v2358_v47  ;;  %2757 = vmatpush.bf16.msra.mxu3 %v2358_v47 }
  0x2e   : > { %604 = vmatmul.bf16.vlgmr.msra.gmra.mxu0 %v2653_v48  ;;  %679 = vmatmul.bf16.vlgmr.msra.gmra.mxu2 %v2668_v53 }
  0x2f   : > { %708 = vmatmul.bf16.vlgmr.msra.gmra.mxu1 %v2653_v48  ;;  %783 = vmatmul.bf16.vlgmr.msra.gmra.mxu3 %v2668_v53 }
  0x3e   : > { %609 = vmatmul.bf16.gmra.mxu0 %v2654_v49  ;;  %684 = vmatmul.bf16.gmra.mxu2 %v2669_v55 }
  0x3f   : > { %713 = vmatmul.bf16.gmra.mxu1 %v2654_v49  ;;  %788 = vmatmul.bf16.gmra.mxu3 %v2669_v55  ;;  %v2666_v55 = vld [vmem:[%s3655_s2 + $0x68] sm:$0xff] }
  0x4e   : > { %614 = vmatmul.bf16.gmra.mxu0 %v2655_v50  ;;  %689 = vmatmul.bf16.gmra.mxu2 %v2670_v57 }
  0x4f   : > { %718 = vmatmul.bf16.gmra.mxu1 %v2655_v50  ;;  %793 = vmatmul.bf16.gmra.mxu3 %v2670_v57 }
  0x5e   : > { %619 = vmatmul.bf16.gmra.mxu0 %v2656_v51  ;;  %694 = vmatmul.bf16.gmra.mxu2 %v2671_v59 }
  0x5f   : > { %723 = vmatmul.bf16.gmra.mxu1 %v2656_v51  ;;  %798 = vmatmul.bf16.gmra.mxu3 %v2671_v59 }
  0x6e   : > { %624 = vmatmul.bf16.gmra.mxu0 %v2657_v52 }
  0x6f   : > { %728 = vmatmul.bf16.gmra.mxu1 %v2657_v52 }
  0x7e   : > { %629 = vmatmul.bf16.gmra.mxu0 %v2658_v54 }
  0x7f   : > { %733 = vmatmul.bf16.gmra.mxu1 %v2658_v54 }
  0x8e   : > { %634 = vmatmul.bf16.gmra.mxu0 %v2659_v56 }
  0x8f   : > { %738 = vmatmul.bf16.gmra.mxu1 %v2659_v56 }
  0x9e   : > { %639 = vmatmul.bf16.gmra.mxu0 %v2660_v58 }
  0x9f   : > { %743 = vmatmul.bf16.gmra.mxu1 %v2660_v58 }
  0xab   : > { %v605_v61 = vpop.f32.mrf.mxu0 }
  0xac   : > { %v709_v62 = vpop.f32.mrf.mxu1 }
  0xad   : > { %v804_v63 = vpack.c.bf16 %v709_v62, %v605_v61 }
  0xae   : > { %644 = vmatmul.bf16.gmra.mxu0 %v2661_v60 }
  0xaf   : > { %748 = vmatmul.bf16.gmra.mxu1 %v2661_v60  ;;  %v1082_v3 = vunpack.c.l.b16 %v804_v63  ;;  %v1603_v4 = vunpack.c.h.b16 %v804_v63 }
  0xb1   : > { %v680_v57 = vpop.f32.mrf.mxu2 }
  0xb2   : > { %v784_v59 = vpop.f32.mrf.mxu3 }
  0xb3   : > { %v607_v0 = vpop.f32.mrf.mxu0 }
  0xb4   : > { %v711_v1 = vpop.f32.mrf.mxu1 }
  0xb5   : > { %v805_v2 = vpack.c.bf16 %v711_v1, %v607_v0 }
  0xb7   : > { %v1604_v5 = vunpack.c.h.b16 %v805_v2  ;;  %v1083_v6 = vunpack.c.l.b16 %v805_v2 }
  0xb9   : > { %v2992_v7 = vpack.c.b16 %v1083_v6, %v1082_v3  ;;  %v2994_v8 = vpack.c.b16 %v1604_v5, %v1603_v4  ;;  %v682_v62 = vpop.f32.mrf.mxu2  ;;  %v2667_v5 = vld [vmem:[%s3655_s2 + $0x70] sm:$0xff] }
  0xba   : > { %v786_v3 = vpop.f32.mrf.mxu3 }
  0xbb   : > { %v610_v10 = vpop.f32.mrf.mxu0 }
  0xbc   : > { %v714_v11 = vpop.f32.mrf.mxu1 }
  0xbd   : > { %v806_v12 = vpack.c.bf16 %v714_v11, %v610_v10 }
  0xbe   : > { %649 = vmatmul.bf16.gmra.mxu0 %v2662_v9 }
  0xbf   : > { %753 = vmatmul.bf16.gmra.mxu1 %v2662_v9  ;;  %v1084_v16 = vunpack.c.l.b16 %v806_v12  ;;  %v1605_v17 = vunpack.c.h.b16 %v806_v12 }
  0xc1   : > { %v3040_v9 = vpop.f32.mrf.mxu2 }
  0xc2   : > { %v3042_v11 = vpop.f32.mrf.mxu3 }
  0xc3   : > { %v612_v13 = vpop.f32.mrf.mxu0 }
  0xc4   : > { %v716_v14 = vpop.f32.mrf.mxu1 }
  0xc5   : > { %v807_v15 = vpack.c.bf16 %v716_v14, %v612_v13 }
  0xc7   : > { %v1606_v18 = vunpack.c.h.b16 %v807_v15  ;;  %v1085_v19 = vunpack.c.l.b16 %v807_v15 }
  0xc9   : > { %v2999_v20 = vpack.c.b16 %v1085_v19, %v1084_v16  ;;  %v3001_v21 = vpack.c.b16 %v1606_v18, %v1605_v17  ;;  %v3044_v14 = vpop.f32.mrf.mxu2 }
  0xca   : > { %v3046_v19 = vpop.f32.mrf.mxu3 }
  0xcb   : > { %v615_v23 = vpop.f32.mrf.mxu0 }
  0xcc   : > { %v719_v24 = vpop.f32.mrf.mxu1 }
  0xcd   : > { %v808_v25 = vpack.c.bf16 %v719_v24, %v615_v23 }
  0xce   : > { %654 = vmatmul.bf16.gmra.mxu0 %v2663_v22 }
  0xcf   : > { %758 = vmatmul.bf16.gmra.mxu1 %v2663_v22  ;;  %v1086_v29 = vunpack.c.l.b16 %v808_v25  ;;  %v1607_v30 = vunpack.c.h.b16 %v808_v25 }
  0xd1   : > { %v690_v25 = vpop.f32.mrf.mxu2 }
  0xd3   : > { %v617_v26 = vpop.f32.mrf.mxu0 }
  0xd4   : > { %v721_v27 = vpop.f32.mrf.mxu1 }
  0xd5   : > { %v809_v28 = vpack.c.bf16 %v721_v27, %v617_v26  ;;  %v794_v26 = vpop.f32.mrf.mxu3 }
  0xd7   : > { %v1608_v31 = vunpack.c.h.b16 %v809_v28  ;;  %v1087_v32 = vunpack.c.l.b16 %v809_v28 }
  0xd9   : > { %v3006_v33 = vpack.c.b16 %v1087_v32, %v1086_v29  ;;  %v3008_v34 = vpack.c.b16 %v1608_v31, %v1607_v30  ;;  %v692_v31 = vpop.f32.mrf.mxu2 }
  0xdb   : > { %v620_v36 = vpop.f32.mrf.mxu0 }
  0xdc   : > { %v724_v37 = vpop.f32.mrf.mxu1 }
  0xdd   : > { %v3013_v38 = vpack.c.bf16 %v724_v37, %v620_v36 }
  0xde   : > { %659 = vmatmul.bf16.gmra.mxu0 %v2664_v35 }
  0xdf   : > { %763 = vmatmul.bf16.gmra.mxu1 %v2664_v35  ;;  %v1609_v42 = vunpack.c.h.b16 %v3013_v38 }
  0xe3   : > { %v622_v39 = vpop.f32.mrf.mxu0 }
  0xe4   : > { %v726_v40 = vpop.f32.mrf.mxu1 }
  0xe5   : > { %v3015_v41 = vpack.c.bf16 %v726_v40, %v622_v39  ;;  %v834_v39 = vpack.c.bf16 %v784_v59, %v680_v57  ;;  %v695_v57 = vpop.f32.mrf.mxu2 }
  0xe7   : > { %v1610_v43 = vunpack.c.h.b16 %v3015_v41 }
  0xe9   : > { %v3019_v44 = vpack.c.b16 %v1610_v43, %v1609_v42 }
  0xeb   : > { %v625_v46 = vpop.f32.mrf.mxu0 }
  0xec   : > { %v729_v47 = vpop.f32.mrf.mxu1 }
  0xed   : > { %v3024_v48 = vpack.c.bf16 %v729_v47, %v625_v46  ;;  %v835_v47 = vpack.c.bf16 %v786_v3, %v682_v62 }
  0xee   : > { %664 = vmatmul.bf16.gmra.mxu0 %v2665_v45 }
  0xef   : > { %768 = vmatmul.bf16.gmra.mxu1 %v2665_v45  ;;  %v1611_v52 = vunpack.c.h.b16 %v3024_v48  ;;  %v796_v45 = vpop.f32.mrf.mxu3  ;;  %v1113_v59 = vunpack.c.l.b16 %v835_v47 }
  0xf3   : > { %v627_v49 = vpop.f32.mrf.mxu0 }
  0xf4   : > { %v731_v50 = vpop.f32.mrf.mxu1 }
  0xf5   : > { %v3026_v51 = vpack.c.bf16 %v731_v50, %v627_v49  ;;  %v1112_v50 = vunpack.c.l.b16 %v834_v39 }
  0xf7   : > { %v1612_v53 = vunpack.c.h.b16 %v3026_v51  ;;  %v1135_v62 = vpack.c.b16 %v1113_v59, %v1112_v50 }
  0xf9   : > { %v3030_v54 = vpack.c.b16 %v1612_v53, %v1611_v52  ;;  %v1633_v53 = vunpack.c.h.b16 %v834_v39  ;;  %1247 = vmatpush.bf16.msrb.mxu3 %v1135_v62  ;;  %v2441_v62 = vld [vmem:[%s3078_s22 + $0x30] sm:$0xf] }
  0xfb   : > { %v630_v56 = vpop.f32.mrf.mxu0 }
  0xfc   : > { %v734_v58 = vpop.f32.mrf.mxu1 }
  0xfd   : > { %v814_v60 = vpack.c.bf16 %v734_v58, %v630_v56 }
  0xfe   : > { %669 = vmatmul.bf16.gmra.mxu0 %v2666_v55 }
  0xff   : > { %773 = vmatmul.bf16.gmra.mxu1 %v2666_v55  ;;  %v1613_v1 = vunpack.c.h.b16 %v814_v60 }
 0x103   : > { %v632_v61 = vpop.f32.mrf.mxu0 }
 0x104   : > { %v736_v63 = vpop.f32.mrf.mxu1 }
 0x105   : > { %v815_v0 = vpack.c.bf16 %v736_v63, %v632_v61  ;;  %v1092_v61 = vunpack.c.l.b16 %v814_v60  ;;  %v1634_v63 = vunpack.c.h.b16 %v835_v47 }
 0x107   : > { %v1614_v2 = vunpack.c.h.b16 %v815_v0  ;;  %v1093_v58 = vunpack.c.l.b16 %v815_v0  ;;  %v1656_v3 = vpack.c.b16 %v1634_v63, %v1633_v53  ;;  %v1089_v0 = vunpack.c.l.b16 %v3015_v41 }
 0x109   : > { %v3035_v4 = vpack.c.b16 %v1614_v2, %v1613_v1  ;;  %v1125_v1 = vpack.c.b16 %v1093_v58, %v1092_v61  ;;  %v1091_v2 = vunpack.c.l.b16 %v3026_v51  ;;  %1767 = vmatpush.bf16.msrb.mxu0 %v1656_v3  ;;  %v2429_v61 = vld [vmem:[%s3078_s22 + $0x18] sm:$0xf]  ;;  %v2695_v3 = vld [vmem:[%s3078_s22 + $0x38] sm:$0xf0] }
 0x10b   : > { %v635_v6 = vpop.f32.mrf.mxu0 }
 0x10c   : > { %v739_v10 = vpop.f32.mrf.mxu1 }
 0x10d   : > { %v816_v12 = vpack.c.bf16 %v739_v10, %v635_v6  ;;  %v1090_v6 = vunpack.c.l.b16 %v3024_v48  ;;  %v697_v48 = vpop.f32.mrf.mxu2 }
 0x10e   : > { %674 = vmatmul.bf16.gmra.mxu0 %v2667_v5 }
 0x10f   : > { %778 = vmatmul.bf16.gmra.mxu1 %v2667_v5  ;;  %v1615_v17 = vunpack.c.h.b16 %v816_v12  ;;  %v1094_v46 = vunpack.c.l.b16 %v816_v12  ;;  %v799_v5 = vpop.f32.mrf.mxu3  ;;  %v1124_v60 = vpack.c.b16 %v1091_v2, %v1090_v6 }
 0x110   : > { %v840_v51 = vpack.c.bf16 %v799_v5, %v695_v57  ;;  %v2692_v57 = vld [vmem:[%s3078_s22 + $0x20] sm:$0xf0] }
 0x111   : > { %v2430_v59 = vor.u32 %v2692_v57, %v2429_v61 }
 0x113   : > { %v637_v13 = vpop.f32.mrf.mxu0 }
 0x114   : > { %v741_v15 = vpop.f32.mrf.mxu1 }
 0x115   : > { %v817_v16 = vpack.c.bf16 %v741_v15, %v637_v13  ;;  %v1088_v13 = vunpack.c.l.b16 %v3013_v38 }
 0x117   : > { %v1616_v18 = vunpack.c.h.b16 %v817_v16  ;;  %v1095_v43 = vunpack.c.l.b16 %v817_v16  ;;  %v1123_v15 = vpack.c.b16 %v1089_v0, %v1088_v13  ;;  %v801_v16 = vpop.f32.mrf.mxu3 }
 0x119   : > { %v3048_v22 = vpack.c.b16 %v1616_v18, %v1615_v17  ;;  %v1126_v56 = vpack.c.b16 %v1095_v43, %v1094_v46  ;;  %v1639_v17 = vunpack.c.h.b16 %v840_v51  ;;  %v841_v18 = vpack.c.bf16 %v801_v16, %v697_v48  ;;  %v2698_v48 = vld [vmem:[%s3078_s22 + $0x50] sm:$0xf0] }
 0x11b   : > { %v640_v23 = vpop.f32.mrf.mxu0 }
 0x11c   : > { %v744_v24 = vpop.f32.mrf.mxu1 }
 0x11d   : > { %v818_v27 = vpack.c.bf16 %v744_v24, %v640_v23  ;;  %v838_v24 = vpack.c.bf16 %v794_v26, %v690_v25  ;;  %v1118_v25 = vunpack.c.l.b16 %v840_v51  ;;  %v1119_v26 = vunpack.c.l.b16 %v841_v18 }
 0x11f   : > { %v1096_v32 = vunpack.c.l.b16 %v818_v27  ;;  %v1617_v35 = vunpack.c.h.b16 %v818_v27  ;;  %v1637_v38 = vunpack.c.h.b16 %v838_v24  ;;  %v1138_v43 = vpack.c.b16 %v1119_v26, %v1118_v25  ;;  %v2704_v25 = vld [vmem:[%s3078_s22 + $0x80] sm:$0xf0] }
 0x123   : > { %v642_v28 = vpop.f32.mrf.mxu0 }
 0x124   : > { %v746_v29 = vpop.f32.mrf.mxu1 }
 0x125   : > { %v819_v30 = vpack.c.bf16 %v746_v29, %v642_v28  ;;  %v1640_v28 = vunpack.c.h.b16 %v841_v18  ;;  %v839_v29 = vpack.c.bf16 %v796_v45, %v692_v31  ;;  %v1116_v31 = vunpack.c.l.b16 %v838_v24 }
 0x127   : > { %v1618_v36 = vunpack.c.h.b16 %v819_v30  ;;  %v1097_v37 = vunpack.c.l.b16 %v819_v30  ;;  %v836_v30 = vpack.c.bf16 %v3042_v11, %v3040_v9 }
 0x129   : > { %v3050_v40 = vpack.c.b16 %v1618_v36, %v1617_v35  ;;  %v1127_v42 = vpack.c.b16 %v1097_v37, %v1096_v32  ;;  %v837_v32 = vpack.c.bf16 %v3046_v19, %v3044_v14  ;;  %v1659_v35 = vpack.c.b16 %v1640_v28, %v1639_v17  ;;  %v2689_v19 = vld [vmem:[%s3078_s22 + $0x8] sm:$0xf0] }
 0x12a   : > { %v1638_v36 = vunpack.c.h.b16 %v839_v29  ;;  %v1635_v37 = vunpack.c.h.b16 %v836_v30  ;;  %v1114_v47 = vunpack.c.l.b16 %v836_v30  ;;  %v2701_v28 = vld [vmem:[%s3078_s22 + $0x68] sm:$0xf0] }
 0x12b   : > { %1189 = vmatpush.bf16.msrb.mxu2 %v1127_v42  ;;  %v645_v49 = vpop.f32.mrf.mxu0  ;;  %1830 = vmatpush.bf16.msrb.mxu1 %v1659_v35  ;;  %v1636_v9 = vunpack.c.h.b16 %v837_v32  ;;  %v1117_v42 = vunpack.c.l.b16 %v839_v29 }
 0x12c   : > { %v749_v52 = vpop.f32.mrf.mxu1  ;;  %v1658_v11 = vpack.c.b16 %v1638_v36, %v1637_v38 }
 0x12d   : > { %v3052_v55 = vpack.c.bf16 %v749_v52, %v645_v49  ;;  %v1657_v45 = vpack.c.b16 %v1636_v9, %v1635_v37  ;;  %v1115_v49 = vunpack.c.l.b16 %v837_v32  ;;  %v2477_v37 = vld [vmem:[%s3078_s22 + $0x78] sm:$0xf] }
 0x12f   : > { %1190 = vmatpush.bf16.msrb.mxu2 %v1126_v56  ;;  %1831 = vmatpush.bf16.msrb.mxu1 %v1658_v11  ;;  %v1136_v53 = vpack.c.b16 %v1115_v49, %v1114_v47 }
 0x133   : > { %1191 = vmatpush.bf16.msrb.mxu2 %v1125_v1  ;;  %v3057_v10 = vpop.f32.mrf.mxu0  ;;  %1832 = vmatpush.bf16.msrb.mxu1 %v1657_v45 }
 0x134   : > { %v3059_v12 = vpop.f32.mrf.mxu1 }
 0x137   : > { %1192 = vmatpush.bf16.msrb.mxu2 %v1124_v60  ;;  %v2442_v60 = vor.u32 %v2695_v3, %v2441_v62 }
 0x13b   : > { %1193 = vmatpush.bf16.msrb.mxu2 %v1123_v15  ;;  %v650_v23 = vpop.f32.mrf.mxu0  ;;  %v2453_v15 = vld [vmem:[%s3078_s22 + $0x48] sm:$0xf] }
 0x13c   : > { %v754_v27 = vpop.f32.mrf.mxu1  ;;  %v2454_v17 = vor.u32 %v2698_v48, %v2453_v15 }
 0x13d   : > { %v3066_v41 = vpack.c.bf16 %v754_v27, %v650_v23  ;;  %v2465_v27 = vld [vmem:[%s3078_s22 + $0x60] sm:$0xf] }
 0x13e   : > { %v2466_v29 = vor.u32 %v2701_v28, %v2465_v27 }
 0x13f   : > { %1194 = vmatpush.bf16.msrb.mxu2 %v3006_v33  ;;  %v2417_v33 = vld [vmem:[%s3078_s22] sm:$0xf] }
 0x140   : > { %v2418_v46 = vor.u32 %v2689_v19, %v2417_v33  ;;  %v2478_v19 = vor.u32 %v2704_v25, %v2477_v37 }
 0x143   : > { %1195 = vmatpush.bf16.msrb.mxu2 %v2999_v20  ;;  %v3081_v14 = vpop.f32.mrf.mxu0  ;;  %v1137_v20 = vpack.c.b16 %v1117_v42, %v1116_v31 }
 0x144   : > { %v3085_v39 = vpop.f32.mrf.mxu1 }
 0x147   : > { %1196 = vmatpush.bf16.msrb.mxu2 %v2992_v7 }
 0x14a   : > { %1197 = vmatmul.bf16.vlgmr.msrb.gmra.mxu2 %v2418_v46 }
 0x14b   : > { %1310 = vmatpush.bf16.msra.mxu2 %v1138_v43  ;;  %v655_v50 = vpop.f32.mrf.mxu0 }
 0x14c   : > { %v759_v52 = vpop.f32.mrf.mxu1 }
 0x14d   : > { %v3088_v56 = vpack.c.bf16 %v759_v52, %v655_v50 }
 0x14f   : > { %1311 = vmatpush.bf16.msra.mxu2 %v1137_v20 }
 0x153   : > { %1312 = vmatpush.bf16.msra.mxu2 %v1136_v53  ;;  %v3090_v58 = vpop.f32.mrf.mxu0 }
 0x154   : > { %v3094_v7 = vpop.f32.mrf.mxu1 }
 0x15a   : > { %1202 = vmatmul.bf16.gmra.mxu2 %v2430_v59 }
 0x15b   : > { %v660_v63 = vpop.f32.mrf.mxu0 }
 0x15c   : > { %v764_v1 = vpop.f32.mrf.mxu1 }
 0x15d   : > { %v3096_v2 = vpack.c.bf16 %v764_v1, %v660_v63 }
 0x163   : > { %v662_v5 = vpop.f32.mrf.mxu0 }
 0x164   : > { %v766_v6 = vpop.f32.mrf.mxu1 }
 0x165   : > { %v827_v57 = vpack.c.bf16 %v766_v6, %v662_v5  ;;  %v1625_v5 = vunpack.c.h.b16 %v3096_v2  ;;  %v2489_v6 = vld [vmem:[%s3078_s22 + $0x90] sm:$0xf] }
 0x167   : > { %v1626_v48 = vunpack.c.h.b16 %v827_v57 }
 0x16a   : > { %1207 = vmatmul.bf16.gmra.mxu2 %v2442_v60 }
 0x16b   : > { %v665_v0 = vpop.f32.mrf.mxu0 }
 0x16c   : > { %v769_v13 = vpop.f32.mrf.mxu1 }
 0x16d   : > { %v828_v52 = vpack.c.bf16 %v769_v13, %v665_v0  ;;  %v1105_v13 = vunpack.c.l.b16 %v827_v57  ;;  %v2425_v57 = vld [vmem:[%s3078_s22 + $0x8] sm:$0xf] }
 0x16f   : > { %v1106_v3 = vunpack.c.l.b16 %v828_v52  ;;  %v1627_v60 = vunpack.c.h.b16 %v828_v52  ;;  %v2697_v52 = vld [vmem:[%s3078_s22 + $0x4c] sm:$0xf] }
 0x173   : > { %v667_v51 = vpop.f32.mrf.mxu0 }
 0x174   : > { %v771_v16 = vpop.f32.mrf.mxu1 }
 0x175   : > { %v829_v46 = vpack.c.bf16 %v771_v16, %v667_v51  ;;  %v825_v51 = vpack.c.bf16 %v3094_v7, %v3090_v58  ;;  %v1104_v16 = vunpack.c.l.b16 %v3096_v2  ;;  %v1102_v7 = vunpack.c.l.b16 %v3088_v56 }
 0x176   : > { %v821_v2 = vpack.c.bf16 %v3059_v12, %v3057_v10  ;;  %v1098_v10 = vunpack.c.l.b16 %v3052_v55  ;;  %v1619_v12 = vunpack.c.h.b16 %v3052_v55  ;;  %v2691_v55 = vld [vmem:[%s3078_s22 + $0x1c] sm:$0xf] }
 0x177   : > { %v1107_v1 = vunpack.c.l.b16 %v829_v46  ;;  %v1628_v62 = vunpack.c.h.b16 %v829_v46  ;;  %v1103_v27 = vunpack.c.l.b16 %v825_v51  ;;  %v1624_v28 = vunpack.c.h.b16 %v825_v51  ;;  %v2513_v46 = vld [vmem:[%s3078_s22 + $0xc0] sm:$0xf] }
 0x178   : > { %v1099_v37 = vunpack.c.l.b16 %v821_v2  ;;  %v1620_v25 = vunpack.c.h.b16 %v821_v2  ;;  %v2437_v51 = vld [vmem:[%s3078_s22 + $0x20] sm:$0xf]  ;;  %v2699_v2 = vld [vmem:[%s3078_s22 + $0x58] sm:$0xf0] }
 0x179   : > { %v1132_v15 = vpack.c.b16 %v1107_v1, %v1106_v3  ;;  %v1653_v0 = vpack.c.b16 %v1628_v62, %v1627_v60  ;;  %v2700_v62 = vld [vmem:[%s3078_s22 + $0x64] sm:$0xf]  ;;  %v2467_v3 = vld [vmem:[%s3078_s22 + $0x6c] sm:$0xf0] }
 0x17a   : > { %1212 = vmatmul.bf16.gmra.mxu2 %v2454_v17  ;;  %v2707_v17 = vld [vmem:[%s3078_s22 + $0x98] sm:$0xf0]  ;;  %v2470_v60 = vor.u32 %v2700_v62, %v2467_v3 }
 0x17b   : > { %v670_v18 = vpop.f32.mrf.mxu0  ;;  %v2490_v58 = vor.u32 %v2707_v17, %v2489_v6  ;;  %v2449_v17 = vld [vmem:[%s3078_s22 + $0x38] sm:$0xf] }
 0x17c   : > { %v774_v23 = vpop.f32.mrf.mxu1 }
 0x17d   : > { %v830_v33 = vpack.c.bf16 %v774_v23, %v670_v18  ;;  %v823_v18 = vpack.c.bf16 %v3085_v39, %v3081_v14  ;;  %v1131_v23 = vpack.c.b16 %v1105_v13, %v1104_v16  ;;  %v1100_v39 = vunpack.c.l.b16 %v3066_v41  ;;  %v2703_v16 = vld [vmem:[%s3078_s22 + $0x7c] sm:$0xf] }
 0x17f   : > { %v1108_v53 = vunpack.c.l.b16 %v830_v33  ;;  %v1629_v61 = vunpack.c.h.b16 %v830_v33  ;;  %v1622_v14 = vunpack.c.h.b16 %v823_v18 }
 0x183   : > { %v672_v24 = vpop.f32.mrf.mxu0 }
 0x184   : > { %v776_v38 = vpop.f32.mrf.mxu1 }
 0x185   : > { %v831_v9 = vpack.c.bf16 %v776_v38, %v672_v24  ;;  %v1652_v24 = vpack.c.b16 %v1626_v48, %v1625_v5  ;;  %v1623_v38 = vunpack.c.h.b16 %v3088_v56  ;;  %v2479_v5 = vld [vmem:[%s3078_s22 + $0x84] sm:$0xf0] }
 0x186   : > { %v2482_v6 = vor.u32 %v2703_v16, %v2479_v5  ;;  %v2721_v16 = vld [vmem:[%s3200_s25 + $0x34] sm:$0xf]  ;;  %v2561_v5 = vld [vmem:[%s3200_s25 + $0x3c] sm:$0xf0] }
 0x187   : > { %v1109_v47 = vunpack.c.l.b16 %v831_v9  ;;  %v1630_v49 = vunpack.c.h.b16 %v831_v9  ;;  %v2419_v9 = vld [vmem:[%s3078_s22 + $0xc] sm:$0xf0] }
 0x189   : > { %v1133_v59 = vpack.c.b16 %v1109_v47, %v1108_v53  ;;  %v1654_v63 = vpack.c.b16 %v1630_v49, %v1629_v61  ;;  %v2713_v47 = vld [vmem:[%s3078_s22 + $0xc8] sm:$0xf0]  ;;  %v3142_v49 = vld [vmem:[%s3078_s22 + $0xd8] sm:$0xff] }
 0x18a   : > { %1217 = vmatmul.bf16.gmra.mxu2 %v2466_v29  ;;  %v1130_v29 = vpack.c.b16 %v1103_v27, %v1102_v7  ;;  %v2455_v53 = vld [vmem:[%s3078_s22 + $0x54] sm:$0xf0] }
 0x18b   : > { %v675_v30 = vpop.f32.mrf.mxu0  ;;  %v2458_v61 = vor.u32 %v2697_v52, %v2455_v53  ;;  %v2497_v53 = vld [vmem:[%s3078_s22 + $0x98] sm:$0xf] }
 0x18c   : > { %v779_v32 = vpop.f32.mrf.mxu1 }
 0x18d   : > { %v832_v35 = vpack.c.bf16 %v779_v32, %v675_v30  ;;  %v1651_v30 = vpack.c.b16 %v1624_v28, %v1623_v38  ;;  %v1101_v32 = vunpack.c.l.b16 %v823_v18  ;;  %v2696_v18 = vld [vmem:[%s3078_s22 + $0x40] sm:$0xf0]  ;;  %v2706_v28 = vld [vmem:[%s3078_s22 + $0x94] sm:$0xf]  ;;  %v2461_v38 = vld [vmem:[%s3078_s22 + $0x50] sm:$0xf] }
 0x18f   : > { %v1110_v31 = vunpack.c.l.b16 %v832_v35  ;;  %v1631_v42 = vunpack.c.h.b16 %v832_v35  ;;  %v1621_v35 = vunpack.c.h.b16 %v3066_v41  ;;  %v1129_v56 = vpack.c.b16 %v1101_v32, %v1100_v39  ;;  %v2503_v39 = vld [vmem:[%s3078_s22 + $0xb4] sm:$0xf0] }
 0x190   : > { %v1649_v41 = vpack.c.b16 %v1620_v25, %v1619_v12  ;;  %v2712_v12 = vld [vmem:[%s3078_s22 + $0xc4] sm:$0xf] }
 0x193   : > { %v677_v36 = vpop.f32.mrf.mxu0 }
 0x194   : > { %v781_v26 = vpop.f32.mrf.mxu1 }
 0x195   : > { %v833_v11 = vpack.c.bf16 %v781_v26, %v677_v36  ;;  %v1650_v36 = vpack.c.b16 %v1622_v14, %v1621_v35  ;;  %v2688_v26 = vld [vmem:[%s3078_s22 + $0x4] sm:$0xf]  ;;  %v2709_v14 = vld [vmem:[%s3078_s22 + $0xac] sm:$0xf] }
 0x196   : > { %v2422_v33 = vor.u32 %v2688_v26, %v2419_v9  ;;  %v2506_v35 = vor.u32 %v2709_v14, %v2503_v39  ;;  %v2515_v26 = vld [vmem:[%s3078_s22 + $0xcc] sm:$0xf0]  ;;  %v2715_v9 = vld [vmem:[%s3200_s25 + $0x4] sm:$0xf]  ;;  %v2547_v39 = vld [vmem:[%s3200_s25 + $0x18] sm:$0xf] }
 0x197   : > { %v1111_v43 = vunpack.c.l.b16 %v833_v11  ;;  %v1632_v45 = vunpack.c.h.b16 %v833_v11  ;;  %v1128_v11 = vpack.c.b16 %v1099_v37, %v1098_v10 }
 0x199   : > { %v1134_v20 = vpack.c.b16 %v1111_v43, %v1110_v31  ;;  %v1655_v50 = vpack.c.b16 %v1632_v45, %v1631_v42  ;;  %v2710_v31 = vld [vmem:[%s3078_s22 + $0xb0] sm:$0xf0]  ;;  %v2431_v43 = vld [vmem:[%s3078_s22 + $0x24] sm:$0xf0] }
 0x19a   : > { %1222 = vmatmul.bf16.gmra.mxu2 %v2478_v19  ;;  %v2501_v19 = vld [vmem:[%s3078_s22 + $0xa8] sm:$0xf]  ;;  %v2434_v45 = vor.u32 %v2691_v55, %v2431_v43  ;;  %v2717_v55 = vld [vmem:[%s3200_s25 + $0x10] sm:$0xf0] }
 0x19b   : > { %1248 = vmatpush.bf16.msrb.mxu3 %v1134_v20  ;;  %1768 = vmatpush.bf16.msrb.mxu0 %v1655_v50  ;;  %v2502_v42 = vor.u32 %v2710_v31, %v2501_v19  ;;  %v991_v20 = vunpack.c.l.b16 %v3142_v49  ;;  %v2485_v19 = vld [vmem:[%s3078_s22 + $0x80] sm:$0xf]  ;;  %v2705_v31 = vld [vmem:[%s3078_s22 + $0x88] sm:$0xf0] }
 0x19f   : > { %1249 = vmatpush.bf16.msrb.mxu3 %v1133_v59  ;;  %1769 = vmatpush.bf16.msrb.mxu0 %v1654_v63  ;;  %v2690_v59 = vld [vmem:[%s3078_s22 + $0x10] sm:$0xf0] }
 0x1a0   : > { %v2426_v63 = vor.u32 %v2690_v59, %v2425_v57  ;;  %v2555_v57 = vld [vmem:[%s3200_s25 + $0x20] sm:$0xf]  ;;  %v2720_v59 = vld [vmem:[%s3200_s25 + $0x28] sm:$0xf0] }
 0x1a3   : > { %1250 = vmatpush.bf16.msrb.mxu3 %v1132_v15  ;;  %1770 = vmatpush.bf16.msrb.mxu0 %v1653_v0  ;;  %v2693_v15 = vld [vmem:[%s3078_s22 + $0x28] sm:$0xf0] }
 0x1a4   : > { %v2438_v13 = vor.u32 %v2693_v15, %v2437_v51  ;;  %v2535_v51 = vld [vmem:[%s3200_s25] sm:$0xf]  ;;  %v2716_v15 = vld [vmem:[%s3200_s25 + $0x8] sm:$0xf0] }
 0x1a7   : > { %1251 = vmatpush.bf16.msrb.mxu3 %v1131_v23  ;;  %1771 = vmatpush.bf16.msrb.mxu0 %v1652_v24  ;;  %v2450_v24 = vor.u32 %v2696_v18, %v2449_v17  ;;  %v2564_v17 = vor.u32 %v2721_v16, %v2561_v5  ;;  %v2509_v18 = vld [vmem:[%s3078_s22 + $0xb0] sm:$0xf] }
 0x1aa   : > { %1227 = vmatmul.bf16.gmra.mxu2 %v2490_v58  ;;  %v2491_v58 = vld [vmem:[%s3078_s22 + $0x9c] sm:$0xf0] }
 0x1ab   : > { %1252 = vmatpush.bf16.msrb.mxu3 %v1130_v29  ;;  %1772 = vmatpush.bf16.msrb.mxu0 %v1651_v30  ;;  %v2494_v7 = vor.u32 %v2706_v28, %v2491_v58  ;;  %v2462_v30 = vor.u32 %v2699_v2, %v2461_v38  ;;  %v2567_v28 = vld [vmem:[%s3200_s25 + $0x38] sm:$0xf]  ;;  %v2723_v58 = vld [vmem:[%s3200_s25 + $0x40] sm:$0xf0] }
 0x1ac   : > { %v2568_v38 = vor.u32 %v2723_v58, %v2567_v28  ;;  %v2730_v58 = vld [vmem:[%s3200_s25 + $0x7c] sm:$0xf] }
 0x1af   : > { %1253 = vmatpush.bf16.msrb.mxu3 %v1129_v56  ;;  %1773 = vmatpush.bf16.msrb.mxu0 %v1650_v36  ;;  %v2473_v56 = vld [vmem:[%s3078_s22 + $0x68] sm:$0xf]  ;;  %v2702_v36 = vld [vmem:[%s3078_s22 + $0x70] sm:$0xf0] }
 0x1b0   : > { %v2474_v25 = vor.u32 %v2702_v36, %v2473_v56  ;;  %v2724_v36 = vld [vmem:[%s3200_s25 + $0x4c] sm:$0xf] }
 0x1b3   : > { %1254 = vmatpush.bf16.msrb.mxu3 %v1128_v11  ;;  %1774 = vmatpush.bf16.msrb.mxu0 %v1649_v41  ;;  %v2537_v11 = vld [vmem:[%s3200_s25 + $0xc] sm:$0xf0]  ;;  %v2518_v41 = vor.u32 %v2712_v12, %v2515_v26 }
 0x1b6   : > { %1255 = vmatmul.bf16.vlgmr.msrb.gmra.mxu3 %v2422_v33  ;;  %v2540_v33 = vor.u32 %v2715_v9, %v2537_v11  ;;  %v2521_v9 = vld [vmem:[%s3078_s22 + $0xc8] sm:$0xf]  ;;  %v2714_v11 = vld [vmem:[%s3078_s22 + $0xd0] sm:$0xf0] }
 0x1b7   : > { %1709 = vmatpush.bf16.msra.mxu3 %v3050_v40  ;;  %v2514_v40 = vor.u32 %v2713_v47, %v2513_v46  ;;  %v2486_v46 = vor.u32 %v2705_v31, %v2485_v19 }
 0x1b8   : > { %1775 = vmatmul.bf16.vlgmr.msrb.gmra.mxu0 %v2540_v33  ;;  %v2726_v33 = vld [vmem:[%s3200_s25 + $0x58] sm:$0xf0] }
 0x1ba   : > { %1232 = vmatmul.bf16.gmra.mxu2 %v2502_v42  ;;  %v2543_v42 = vld [vmem:[%s3200_s25 + $0x8] sm:$0xf] }
 0x1bb   : > { %1710 = vmatpush.bf16.msra.mxu3 %v3048_v22  ;;  %v2694_v22 = vld [vmem:[%s3078_s22 + $0x34] sm:$0xf] }
 0x1bf   : > { %1711 = vmatpush.bf16.msra.mxu3 %v3035_v4 }
 0x1c3   : > { %1712 = vmatpush.bf16.msra.mxu3 %v3030_v54  ;;  %v2443_v54 = vld [vmem:[%s3078_s22 + $0x3c] sm:$0xf0] }
 0x1c6   : > { %1260 = vmatmul.bf16.gmra.mxu3 %v2434_v45  ;;  %v2544_v45 = vor.u32 %v2717_v55, %v2543_v42  ;;  %v2522_v42 = vor.u32 %v2714_v11, %v2521_v9 }
 0x1c7   : > { %1713 = vmatpush.bf16.msra.mxu3 %v3019_v44  ;;  %v2446_v44 = vor.u32 %v2694_v22, %v2443_v54  ;;  %v992_v22 = vunpack.c.h.b16 %v3142_v49  ;;  %v2556_v49 = vor.u32 %v2720_v59, %v2555_v57 }
 0x1c8   : > { %2641 = vmatmul.msk.bf16.vlgmr.msrb.gmra.mxu1 %vm1158_vm0, %v2544_v45 }
 0x1ca   : > { %1237 = vmatmul.bf16.gmra.mxu2 %v2514_v40 }
 0x1cb   : > { %1714 = vmatpush.bf16.msra.mxu3 %v3008_v34  ;;  %v1021_v34 = vpack.c.b16 %v991_v20, %v991_v20  ;;  %v2549_v20 = vld [vmem:[%s3200_s25 + $0x24] sm:$0xf0] }
 0x1cd   : > { %v3137_v4 = vpop.f32.mrf.mxu2 }
 0x1cf   : > { %1715 = vmatpush.bf16.msra.mxu3 %v3001_v21 }
 0x1d3   : > { %1716 = vmatpush.bf16.msra.mxu3 %v2994_v8 }
 0x1d5   : > { %v3146_v50 = vpop.f32.mrf.mxu2 }
 0x1d6   : > { %1265 = vmatmul.bf16.gmra.mxu3 %v2446_v44  ;;  %v2718_v44 = vld [vmem:[%s3200_s25 + $0x1c] sm:$0xf] }
 0x1d7   : > { %v2552_v52 = vor.u32 %v2718_v44, %v2549_v20  ;;  %v2559_v44 = vld [vmem:[%s3200_s25 + $0x30] sm:$0xf]  ;;  %v2722_v20 = vld [vmem:[%s3200_s25 + $0x38] sm:$0xf0] }
 0x1d8   : > { %2642 = vmatmul.msk.bf16.gmra.mxu1 %vm1158_vm0, %v2556_v49  ;;  %v2560_v57 = vor.u32 %v2722_v20, %v2559_v44 }
 0x1d9   : > { %1780 = vmatmul.bf16.gmra.mxu0 %v2552_v52 }
 0x1da   : > { %1242 = vmatmul.bf16.gmra.mxu2 %v1021_v34  ;;  %v1022_v34 = vpack.c.b16 %v992_v22, %v992_v22 }
 0x1dd   : > { %v3148_v21 = vpop.f32.mrf.mxu2 }
 0x1e5   : > { %v3154_v8 = vpop.f32.mrf.mxu2 }
 0x1e6   : > { %1270 = vmatmul.bf16.gmra.mxu3 %v2458_v61  ;;  %v2708_v61 = vld [vmem:[%s3078_s22 + $0xa0] sm:$0xf0] }
 0x1e7   : > { %v2498_v62 = vor.u32 %v2708_v61, %v2497_v53  ;;  %v2727_v53 = vld [vmem:[%s3200_s25 + $0x64] sm:$0xf]  ;;  %v2585_v61 = vld [vmem:[%s3200_s25 + $0x6c] sm:$0xf0] }
 0x1e8   : > { %2643 = vmatmul.msk.bf16.gmra.mxu1 %vm1158_vm0, %v2568_v38  ;;  %v2588_v49 = vor.u32 %v2727_v53, %v2585_v61  ;;  %v2597_v38 = vld [vmem:[%s3200_s25 + $0x84] sm:$0xf0] }
 0x1e9   : > { %1785 = vmatmul.bf16.gmra.mxu0 %v2564_v17 }
 0x1ea   : > { %2523 = vmatmul.msk.bf16.vlgmr.msra.gmra.mxu2 %vm1158_vm0, %v2426_v63 }
 0x1ed   : > { %v3157_v1 = vpop.f32.mrf.mxu2 }
 0x1f5   : > { %v3163_v0 = vpop.f32.mrf.mxu2 }
 0x1f6   : > { %1275 = vmatmul.bf16.gmra.mxu3 %v2470_v60 }
 0x1fa   : > { %2524 = vmatmul.msk.bf16.gmra.mxu2 %vm1158_vm0, %v2438_v13 }
 0x1fd   : > { %v3166_v48 = vpop.f32.mrf.mxu2 }
 0x205   : > { %v3172_v23 = vpop.f32.mrf.mxu2 }
 0x206   : > { %1280 = vmatmul.bf16.gmra.mxu3 %v2482_v6  ;;  %v2536_v6 = vor.u32 %v2716_v15, %v2535_v51 }
 0x20a   : > { %2525 = vmatmul.msk.bf16.gmra.mxu2 %vm1158_vm0, %v2450_v24  ;;  %v2711_v24 = vld [vmem:[%s3078_s22 + $0xb8] sm:$0xf0] }
 0x20b   : > { %v2510_v2 = vor.u32 %v2711_v24, %v2509_v18  ;;  %v2571_v18 = vld [vmem:[%s3200_s25 + $0x48] sm:$0xf]  ;;  %v2725_v24 = vld [vmem:[%s3200_s25 + $0x50] sm:$0xf0] }
 0x20d   : > { %v3175_v27 = vpop.f32.mrf.mxu2 }
 0x215   : > { %v3181_v29 = vpop.f32.mrf.mxu2 }
 0x216   : > { %1285 = vmatmul.bf16.gmra.mxu3 %v2494_v7 }
 0x21a   : > { %2526 = vmatmul.msk.bf16.gmra.mxu2 %vm1158_vm0, %v2462_v30 }
 0x21d   : > { %v3184_v32 = vpop.f32.mrf.mxu2 }
 0x225   : > { %v3190_v37 = vpop.f32.mrf.mxu2 }
 0x226   : > { %1290 = vmatmul.bf16.gmra.mxu3 %v2506_v35  ;;  %v2719_v35 = vld [vmem:[%s3200_s25 + $0x20] sm:$0xf0] }
 0x227   : > { %v2548_v12 = vor.u32 %v2719_v35, %v2547_v39  ;;  %v2600_v39 = vor.u32 %v2730_v58, %v2597_v38  ;;  %v2603_v35 = vld [vmem:[%s3200_s25 + $0x80] sm:$0xf] }
 0x22a   : > { %2527 = vmatmul.msk.bf16.gmra.mxu2 %vm1158_vm0, %v2474_v25  ;;  %v2573_v25 = vld [vmem:[%s3200_s25 + $0x54] sm:$0xf0] }
 0x22b   : > { %v2576_v26 = vor.u32 %v2724_v36, %v2573_v25 }
 0x22d   : > { %v3193_v10 = vpop.f32.mrf.mxu2  ;;  %1790 = vmatmul.bf16.gmra.mxu0 %v2576_v26 }
 0x235   : > { %v3210_v43 = vpop.f32.mrf.mxu2 }
 0x236   : > { %1295 = vmatmul.bf16.gmra.mxu3 %v2518_v41  ;;  %v2579_v41 = vld [vmem:[%s3200_s25 + $0x50] sm:$0xf] }
 0x237   : > { %v2580_v31 = vor.u32 %v2726_v33, %v2579_v41 }
 0x239   : > { %v1256_v47 = vpop.f32.mrf.mxu3  ;;  %2644 = vmatmul.msk.bf16.gmra.mxu1 %vm1158_vm0, %v2580_v31  ;;  %v2609_v31 = vld [vmem:[%s3200_s25 + $0x9c] sm:$0xf0] }
 0x23a   : > { %2528 = vmatmul.msk.bf16.gmra.mxu2 %vm1158_vm0, %v2486_v46  ;;  %v1257_v45 = vadd.f32 %v1256_v47, %v3137_v4  ;;  %v2729_v4 = vld [vmem:[%s3200_s25 + $0x70] sm:$0xf0] }
 0x23d   : > { %v3214_v40 = vpop.f32.mrf.mxu2  ;;  %1795 = vmatmul.bf16.gmra.mxu0 %v2588_v49 }
 0x241   : > { %v3217_v54 = vpop.f32.mrf.mxu3 }
 0x242   : > { %v1259_v51 = vadd.f32 %v3217_v54, %v3146_v50 }
 0x245   : > { %v3225_v63 = vpop.f32.mrf.mxu2 }
 0x246   : > { %1300 = vmatmul.bf16.gmra.mxu3 %v1022_v34  ;;  %v898_v34 = vld [vmem:[%s3078_s22 + $0xe0] sm:$0xf] }
 0x247   : > { %v993_v59 = vunpack.c.l.b16 %v898_v34 }
 0x249   : > { %v3228_v3 = vpop.f32.mrf.mxu3  ;;  %v1023_v5 = vpack.c.b16 %v993_v59, %v993_v59 }
 0x24a   : > { %2529 = vmatmul.msk.bf16.gmra.mxu2 %vm1158_vm0, %v2498_v62  ;;  %v2591_v62 = vld [vmem:[%s3200_s25 + $0x68] sm:$0xf]  ;;  %v1262_v50 = vadd.f32 %v3228_v3, %v3148_v21  ;;  %v2732_v21 = vld [vmem:[%s3200_s25 + $0x88] sm:$0xf0] }
 0x24b   : > { %v2592_v15 = vor.u32 %v2729_v4, %v2591_v62  ;;  %v2604_v25 = vor.u32 %v2732_v21, %v2603_v35  ;;  %v2736_v62 = vld [vmem:[%s3200_s25 + $0xac] sm:$0xf]  ;;  %v2739_v35 = vld [vmem:[%s3200_s25 + $0xc4] sm:$0xf] }
 0x24d   : > { %v3231_v60 = vpop.f32.mrf.mxu2  ;;  %2645 = vmatmul.msk.bf16.gmra.mxu1 %vm1158_vm0, %v2592_v15  ;;  %1800 = vmatmul.bf16.gmra.mxu0 %v2600_v39  ;;  %v2627_v15 = vld [vmem:[%s3200_s25 + $0xb0] sm:$0xf]  ;;  %v1776_v39 = vpop.f32.mrf.mxu0 }
 0x251   : > { %v3235_v13 = vpop.f32.mrf.mxu3 }
 0x252   : > { %v1264_v36 = vadd.f32 %v3235_v13, %v3154_v8  ;;  %v2583_v8 = vld [vmem:[%s3200_s25 + $0x60] sm:$0xf]  ;;  %v2728_v13 = vld [vmem:[%s3200_s25 + $0x68] sm:$0xf0] }
 0x255   : > { %v3243_v7 = vpop.f32.mrf.mxu2 }
 0x256   : > { %1717 = vmatmul.bf16.vlgmr.msra.gmra.mxu3 %v2536_v6 }
 0x259   : > { %v3246_v30 = vpop.f32.mrf.mxu3 }
 0x25a   : > { %2530 = vmatmul.msk.bf16.gmra.mxu2 %vm1158_vm0, %v2510_v2  ;;  %v2572_v2 = vor.u32 %v2725_v24, %v2571_v18  ;;  %v1267_v9 = vadd.f32 %v3246_v30, %v3157_v1  ;;  %v2735_v1 = vld [vmem:[%s3200_s25 + $0xa0] sm:$0xf0] }
 0x25d   : > { %v3249_v14 = vpop.f32.mrf.mxu2  ;;  %2646 = vmatmul.msk.bf16.gmra.mxu1 %vm1158_vm0, %v2604_v25  ;;  %v2639_v25 = vld [vmem:[%s3200_s25 + $0xc8] sm:$0xf] }
 0x261   : > { %v3253_v56 = vpop.f32.mrf.mxu3 }
 0x262   : > { %v1269_v44 = vadd.f32 %v3253_v56, %v3163_v0  ;;  %v2595_v0 = vld [vmem:[%s3200_s25 + $0x78] sm:$0xf]  ;;  %v2731_v56 = vld [vmem:[%s3200_s25 + $0x80] sm:$0xf0] }
 0x263   : > { %v2596_v4 = vor.u32 %v2731_v56, %v2595_v0 }
 0x265   : > { %v1245_v19 = vpop.f32.mrf.mxu2 }
 0x266   : > { %1722 = vmatmul.bf16.gmra.mxu3 %v2548_v12  ;;  %v2733_v19 = vld [vmem:[%s3200_s25 + $0x94] sm:$0xf] }
 0x269   : > { %v3262_v55 = vpop.f32.mrf.mxu3 }
 0x26a   : > { %2531 = vmatmul.msk.bf16.gmra.mxu2 %vm1158_vm0, %v2522_v42  ;;  %v2584_v42 = vor.u32 %v2728_v13, %v2583_v8  ;;  %v1272_v61 = vadd.f32 %v3262_v55, %v3166_v48  ;;  %v2738_v48 = vld [vmem:[%s3200_s25 + $0xb8] sm:$0xf0] }
 0x26d   : > { %v1314_v46 = vpop.f32.mrf.mxu2 }
 0x26e   : > { %v3266_v22 = vadd.f32 %v1314_v46, %v1257_v45  ;;  %v2612_v45 = vor.u32 %v2733_v19, %v2609_v31  ;;  %v2615_v46 = vld [vmem:[%s3200_s25 + $0x98] sm:$0xf]  ;;  %v3358_v31 = vpop.f32.mrf.mxu0 }
 0x26f   : > { %v2616_v20 = vor.u32 %v2735_v1, %v2615_v46  ;;  %v2619_v46 = vld [vmem:[%s3200_s25 + $0xa8] sm:$0xf]  ;;  %v1456_v1 = vld [vmem:[%s3200_s25 + $0xd8] sm:$0xff] }
 0x270   : > { %1805 = vmatmul.bf16.gmra.mxu0 %v2612_v45 }
 0x271   : > { %v3271_v52 = vpop.f32.mrf.mxu3  ;;  %2647 = vmatmul.msk.bf16.gmra.mxu1 %vm1158_vm0, %v2616_v20 }
 0x275   : > { %v1316_v47 = vpop.f32.mrf.mxu2 }
 0x276   : > { %v3279_v16 = vadd.f32 %v1316_v47, %v1259_v51  ;;  %1727 = vmatmul.bf16.gmra.mxu3 %v2560_v57  ;;  %v2621_v51 = vld [vmem:[%s3200_s25 + $0xb4] sm:$0xf0] }
 0x277   : > { %v2624_v47 = vor.u32 %v2736_v62, %v2621_v51 }
 0x279   : > { %v1276_v6 = vpop.f32.mrf.mxu3 }
 0x27a   : > { %2532 = vmatmul.msk.bf16.gmra.mxu2 %vm1158_vm0, %v1023_v5  ;;  %v1274_v5 = vadd.f32 %v3271_v52, %v3172_v23  ;;  %v1277_v24 = vadd.f32 %v1276_v6, %v3175_v27  ;;  %v2607_v23 = vld [vmem:[%s3200_s25 + $0x90] sm:$0xf]  ;;  %v2734_v52 = vld [vmem:[%s3200_s25 + $0x98] sm:$0xf0]  ;;  %v2741_v27 = vld [vmem:[%s3200_s25 + $0xd0] sm:$0xf0] }
 0x27b   : > { %v2608_v21 = vor.u32 %v2734_v52, %v2607_v23  ;;  %v2640_v8 = vor.u32 %v2741_v27, %v2639_v25  ;;  %v1924_v52 = vld [vmem:[%s3657_s4] sm:$0xff] }
 0x27d   : > { %v1319_v54 = vpop.f32.mrf.mxu2 }
 0x27e   : > { %v3285_v17 = vadd.f32 %v1319_v54, %v1262_v50  ;;  %v2628_v50 = vor.u32 %v2738_v48, %v2627_v15 }
 0x280   : > { %1810 = vmatmul.bf16.gmra.mxu0 %v2624_v47 }
 0x281   : > { %v3289_v28 = vpop.f32.mrf.mxu3  ;;  %2648 = vmatmul.msk.bf16.gmra.mxu1 %vm1158_vm0, %v2628_v50  ;;  %v2631_v50 = vld [vmem:[%s3200_s25 + $0xc0] sm:$0xf] }
 0x285   : > { %v1321_v3 = vpop.f32.mrf.mxu2 }
 0x286   : > { %v3297_v12 = vadd.f32 %v1321_v3, %v1264_v36  ;;  %1732 = vmatmul.bf16.gmra.mxu3 %v2572_v2  ;;  %v2633_v36 = vld [vmem:[%s3200_s25 + $0xcc] sm:$0xf0] }
 0x287   : > { %v2636_v3 = vor.u32 %v2739_v35, %v2633_v36 }
 0x289   : > { %v3300_v26 = vpop.f32.mrf.mxu3 }
 0x28d   : > { %v1324_v11 = vpop.f32.mrf.mxu2 }
 0x28e   : > { %v3304_v41 = vadd.f32 %v1324_v11, %v1267_v9  ;;  %v1279_v9 = vadd.f32 %v3289_v28, %v3181_v29  ;;  %v1834_v11 = vpop.f32.mrf.mxu1  ;;  %v1282_v29 = vadd.f32 %v3300_v26, %v3184_v32 }
 0x290   : > { %1815 = vmatmul.bf16.gmra.mxu0 %v2636_v3 }
 0x291   : > { %v3308_v33 = vpop.f32.mrf.mxu3  ;;  %2649 = vmatmul.msk.bf16.gmra.mxu1 %vm1158_vm0, %v2640_v8 }
 0x292   : > { %v1284_v32 = vadd.f32 %v3308_v33, %v3190_v37 }
 0x295   : > { %v1326_v30 = vpop.f32.mrf.mxu2 }
 0x296   : > { %v3316_v34 = vadd.f32 %v1326_v30, %v1269_v44  ;;  %1737 = vmatmul.bf16.gmra.mxu3 %v2584_v42  ;;  %v3362_v28 = vpop.f32.mrf.mxu1  ;;  %v2737_v44 = vld [vmem:[%s3200_s25 + $0xb0] sm:$0xf0]  ;;  %v1551_v30 = vunpack.c.h.b16 %v1456_v1 }
 0x297   : > { %v2620_v0 = vor.u32 %v2737_v44, %v2619_v46 }
 0x298   : > { %v1581_v56 = vpack.c.b16 %v1551_v30, %v1551_v30 }
 0x299   : > { %v3319_v53 = vpop.f32.mrf.mxu3 }
 0x29a   : > { %v1287_v48 = vadd.f32 %v3319_v53, %v3193_v10  ;;  %v3402_v10 = vperm.slane %v1924_v52, 0 }
 0x29c   : > { %v1945_v25 = vadd.f32 %v3402_v10, %v3266_v22 }
 0x29d   : > { %v1329_v57 = vpop.f32.mrf.mxu2 }
 0x29e   : > { %v3323_v59 = vadd.f32 %v1329_v57, %v1272_v61  ;;  %v3371_v61 = vpop.f32.mrf.mxu0  ;;  %v1457_v57 = vld [vmem:[%s3200_s25 + $0xe0] sm:$0xf]  ;;  %v3376_v26 = vpop.f32.mrf.mxu1  ;;  %vm1964_vm1 = vcmp.ge.f32.partialorder %v1945_v25, 0.0 }
 0x29f   : > { %v1552_v62 = vunpack.c.l.b16 %v1457_v57 }
 0x2a0   : > { %1820 = vmatmul.bf16.gmra.mxu0 %v1581_v56 }
 0x2a1   : > { %v3327_v49 = vpop.f32.mrf.mxu3 }
 0x2a2   : > { %v1289_v36 = vadd.f32 %v3327_v49, %v3210_v43 }
 0x2a5   : > { %v1331_v55 = vpop.f32.mrf.mxu2 }
 0x2a6   : > { %v3335_v54 = vadd.f32 %v1331_v55, %v1274_v5  ;;  %1742 = vmatmul.bf16.gmra.mxu3 %v2596_v4  ;;  %v1582_v4 = vpack.c.b16 %v1552_v62, %v1552_v62  ;;  %v3383_v5 = vpop.f32.mrf.mxu0  ;;  %v3387_v55 = vpop.f32.mrf.mxu1 }
 0x2a8   : > { %2650 = vmatmul.msk.bf16.gmra.mxu1 %vm1158_vm0, %v1582_v4 }
 0x2a9   : > { %v3338_v18 = vpop.f32.mrf.mxu3 }
 0x2aa   : > { %v1292_v43 = vadd.f32 %v3338_v18, %v3214_v40 }
 0x2ad   : > { %v1334_v58 = vpop.f32.mrf.mxu2 }
 0x2ae   : > { %v3341_v38 = vadd.f32 %v1334_v58, %v1277_v24  ;;  %v2740_v24 = vld [vmem:[%s3200_s25 + $0xc8] sm:$0xf0]  ;;  %v3393_v23 = vpop.f32.mrf.mxu0 }
 0x2af   : > { %v2632_v35 = vor.u32 %v2740_v24, %v2631_v50 }
 0x2b1   : > { %v3345_v2 = vpop.f32.mrf.mxu3 }
 0x2b5   : > { %v1336_v6 = vpop.f32.mrf.mxu2 }
 0x2b6   : > { %v3353_v13 = vadd.f32 %v1336_v6, %v1279_v9  ;;  %1747 = vmatmul.bf16.gmra.mxu3 %v2608_v21  ;;  %v3400_v21 = vpop.f32.mrf.mxu1  ;;  %v3408_v9 = vperm.slane %v1924_v52, 2  ;;  %v3410_v6 = vpop.f32.mrf.mxu0 }
 0x2b8   : > { %v1984_v44 = vmul.f32 %v3408_v9, %v1945_v25 }
 0x2b9   : > { %v3356_v19 = vpop.f32.mrf.mxu3 }
 0x2ba   : > { %v2003_v56 = vsel %vm1964_vm1, %v1945_v25, %v1984_v44 }
 0x2bd   : > { %v1339_v42 = vpop.f32.mrf.mxu2 }
 0x2be   : > { %v3364_v45 = vadd.f32 %v1339_v42, %v1282_v29  ;;  %v3412_v29 = vperm.slane %v1924_v52, 1  ;;  %v3416_v42 = vperm.slane %v1924_v52, 3  ;;  %v3418_v46 = vpop.f32.mrf.mxu1  ;;  %v3426_v18 = vpop.f32.mrf.mxu0 }
 0x2c1   : > { %v3369_v20 = vpop.f32.mrf.mxu3 }
 0x2c5   : > { %v1341_v51 = vpop.f32.mrf.mxu2 }
 0x2c6   : > { %v3378_v47 = vadd.f32 %v1341_v51, %v1284_v32  ;;  %1752 = vmatmul.bf16.gmra.mxu3 %v2620_v0  ;;  %v1550_v0 = vunpack.c.l.b16 %v1456_v1  ;;  %v3447_v52 = vpop.f32.mrf.mxu0 }
 0x2c8   : > { %v1580_v51 = vpack.c.b16 %v1550_v0, %v1550_v0 }
 0x2c9   : > { %v3381_v15 = vpop.f32.mrf.mxu3 }
 0x2cd   : > { %v1344_v37 = vpop.f32.mrf.mxu2 }
 0x2ce   : > { %v3389_v33 = vadd.f32 %v1344_v37, %v1287_v48  ;;  %v1294_v48 = vadd.f32 %v3345_v2, %v3225_v63  ;;  %v3439_v37 = vpop.f32.mrf.mxu1 }
 0x2d1   : > { %v1303_v58 = vpop.f32.mrf.mxu3 }
 0x2d5   : > { %v1346_v53 = vpop.f32.mrf.mxu2 }
 0x2d6   : > { %v3404_v3 = vadd.f32 %v1346_v53, %v1289_v36  ;;  %1757 = vmatmul.bf16.gmra.mxu3 %v2632_v35  ;;  %v1947_v35 = vadd.f32 %v3402_v10, %v3285_v17 }
 0x2d8   : > { %vm1966_vm5 = vcmp.ge.f32.partialorder %v1947_v35, 0.0 }
 0x2d9   : > { %v1718_v27 = vpop.f32.mrf.mxu3 }
 0x2da   : > { %v1777_v8 = vadd.f32 %v1776_v39, %v1718_v27  ;;  %v1297_v27 = vadd.f32 %v3356_v19, %v3231_v60  ;;  %v3463_v60 = vpop.f32.mrf.mxu0 }
 0x2dc   : > { %v1835_v49 = vadd.f32 %v1834_v11, %v1777_v8  ;;  %v1946_v11 = vadd.f32 %v3402_v10, %v3279_v16 }
 0x2dd   : > { %v1349_v22 = vpop.f32.mrf.mxu2 }
 0x2de   : > { %v2042_v30 = vadd.f32 %v3412_v29, %v1835_v49  ;;  %v3422_v57 = vadd.f32 %v1349_v22, %v1292_v43  ;;  %v1985_v24 = vmul.f32 %v3408_v9, %v1946_v11  ;;  %vm1965_vm3 = vcmp.ge.f32.partialorder %v1946_v11, 0.0  ;;  %v3455_v43 = vpop.f32.mrf.mxu1 }
 0x2df   : > { %v1986_v22 = vmul.f32 %v3408_v9, %v1947_v35 }
 0x2e0   : > { %vm2061_vm2 = vcmp.ge.f32.partialorder %v2042_v30, 0.0  ;;  %v2081_v39 = vmul.f32 %v3416_v42, %v2042_v30 }
 0x2e1   : > { %v1720_v40 = vpop.f32.mrf.mxu3  ;;  %v2005_v19 = vsel %vm1966_vm5, %v1947_v35, %v1986_v22 }
 0x2e2   : > { %v2100_v62 = vsel %vm2061_vm2, %v2042_v30, %v2081_v39  ;;  %v1779_v32 = vadd.f32 %v3358_v31, %v1720_v40 }
 0x2e3   : > { %v2119_v4 = vadd.f32 %v2100_v62, %v2003_v56 }
 0x2e4   : > { %v1837_v1 = vadd.f32 %v3362_v28, %v1779_v32  ;;  %v2004_v28 = vsel %vm1965_vm3, %v1946_v11, %v1985_v24  ;;  %v1299_v11 = vadd.f32 %v3369_v20, %v3243_v7  ;;  %v3479_v7 = vpop.f32.mrf.mxu0 }
 0x2e5   : > { %v2138_v50 = vmul.f32 0.5, %v2119_v4  ;;  %v1351_v16 = vpop.f32.mrf.mxu2 }
 0x2e6   : > { %v2043_v31 = vadd.f32 %v3412_v29, %v1837_v1  ;;  %v3443_v58 = vadd.f32 %v1351_v16, %v1294_v48  ;;  %1762 = vmatmul.bf16.gmra.mxu3 %v1580_v51  ;;  %v3471_v32 = vpop.f32.mrf.mxu1 }
 0x2e7   : > { %2157 = vst [vmem:[%s3436_s6] sm:$0xff] %v2138_v50 }
 0x2e8   : > { %vm2062_vm4 = vcmp.ge.f32.partialorder %v2043_v31, 0.0  ;;  %v2082_v63 = vmul.f32 %v3416_v42, %v2043_v31 }
 0x2e9   : > { %v1723_v2 = vpop.f32.mrf.mxu3 }
 0x2ea   : > { %v2101_v36 = vsel %vm2062_vm4, %v2043_v31, %v2082_v63  ;;  %v1782_v53 = vadd.f32 %v3371_v61, %v1723_v2  ;;  %v1302_v63 = vadd.f32 %v3381_v15, %v3249_v14 }
 0x2eb   : > { %v2120_v25 = vadd.f32 %v2101_v36, %v2004_v28 }
 0x2ec   : > { %v1840_v8 = vadd.f32 %v3376_v26, %v1782_v53  ;;  %v1948_v26 = vadd.f32 %v3402_v10, %v3297_v12  ;;  %v3495_v14 = vpop.f32.mrf.mxu0 }
 0x2ed   : > { %v2139_v49 = vmul.f32 0.5, %v2120_v25  ;;  %v1354_v44 = vpop.f32.mrf.mxu2 }
 0x2ee   : > { %v2044_v30 = vadd.f32 %v3412_v29, %v1840_v8  ;;  %v3459_v0 = vadd.f32 %v1354_v44, %v1297_v27  ;;  %v1987_v48 = vmul.f32 %v3408_v9, %v1948_v26  ;;  %vm1967_vm7 = vcmp.ge.f32.partialorder %v1948_v26, 0.0  ;;  %v3487_v28 = vpop.f32.mrf.mxu1 }
 0x2ef   : > { %2158 = vst [vmem:[%s3436_s6 + $0x8] sm:$0xff] %v2139_v49 }
 0x2f0   : > { %vm2063_vm6 = vcmp.ge.f32.partialorder %v2044_v30, 0.0  ;;  %v2083_v17 = vmul.f32 %v3416_v42, %v2044_v30  ;;  %v2006_v20 = vsel %vm1967_vm7, %v1948_v26, %v1987_v48 }
 0x2f1   : > { %v1725_v61 = vpop.f32.mrf.mxu3 }
 0x2f2   : > { %v2102_v39 = vsel %vm2063_vm6, %v2044_v30, %v2083_v17  ;;  %v1784_v56 = vadd.f32 %v3383_v5, %v1725_v61 }
 0x2f3   : > { %v2121_v40 = vadd.f32 %v2102_v39, %v2005_v19 }
 0x2f4   : > { %v1842_v62 = vadd.f32 %v3387_v55, %v1784_v56  ;;  %v1949_v55 = vadd.f32 %v3402_v10, %v3304_v41  ;;  %v3507_v56 = vpop.f32.mrf.mxu0 }
 0x2f5   : > { %v2140_v51 = vmul.f32 0.5, %v2121_v40  ;;  %v1356_v4 = vpop.f32.mrf.mxu2 }
 0x2f6   : > { %v2045_v1 = vadd.f32 %v3412_v29, %v1842_v62  ;;  %v3475_v50 = vadd.f32 %v1356_v4, %v1299_v11  ;;  %v1988_v53 = vmul.f32 %v3408_v9, %v1949_v55  ;;  %vm1968_vm9 = vcmp.ge.f32.partialorder %v1949_v55, 0.0  ;;  %v3501_v30 = vpop.f32.mrf.mxu1 }
 0x2f7   : > { %2159 = vst [vmem:[%s3436_s6 + $0x10] sm:$0xff] %v2140_v51 }
 0x2f8   : > { %vm2064_vm8 = vcmp.ge.f32.partialorder %v2045_v1, 0.0  ;;  %v2084_v12 = vmul.f32 %v3416_v42, %v2045_v1  ;;  %v2007_v15 = vsel %vm1968_vm9, %v1949_v55, %v1988_v53 }
 0x2f9   : > { %v1728_v5 = vpop.f32.mrf.mxu3 }
 0x2fa   : > { %v2103_v16 = vsel %vm2064_vm8, %v2045_v1, %v2084_v12  ;;  %v1787_v24 = vadd.f32 %v3393_v23, %v1728_v5 }
 0x2fb   : > { %v2122_v31 = vadd.f32 %v2103_v16, %v2006_v20 }
 0x2fc   : > { %v1845_v2 = vadd.f32 %v3400_v21, %v1787_v24  ;;  %v1950_v21 = vadd.f32 %v3402_v10, %v3316_v34  ;;  %v3519_v20 = vpop.f32.mrf.mxu0 }
 0x2fd   : > { %v2141_v35 = vmul.f32 0.5, %v2122_v31  ;;  %v1359_v36 = vpop.f32.mrf.mxu2 }
 0x2fe   : > { %v2046_v25 = vadd.f32 %v3412_v29, %v1845_v2  ;;  %v3491_v27 = vadd.f32 %v1359_v36, %v1302_v63  ;;  %v1989_v19 = vmul.f32 %v3408_v9, %v1950_v21  ;;  %vm1969_vm11 = vcmp.ge.f32.partialorder %v1950_v21, 0.0  ;;  %v3513_v4 = vpop.f32.mrf.mxu1 }
 0x2ff   : > { %2160 = vst [vmem:[%s3436_s6 + $0x18] sm:$0xff] %v2141_v35 }
 0x300   : > { %vm2065_vm10 = vcmp.ge.f32.partialorder %v2046_v25, 0.0  ;;  %v2085_v41 = vmul.f32 %v3416_v42, %v2046_v25 }
 0x301   : > { %v1730_v23 = vpop.f32.mrf.mxu3 }
 0x302   : > { %v2104_v8 = vsel %vm2065_vm10, %v2046_v25, %v2085_v41  ;;  %v1789_v49 = vadd.f32 %v3410_v6, %v1730_v23  ;;  %v2008_v6 = vsel %vm1969_vm11, %v1950_v21, %v1989_v19 }
 0x303   : > { %v2123_v44 = vadd.f32 %v2104_v8, %v2007_v15 }
 0x304   : > { %v1847_v22 = vadd.f32 %v3418_v46, %v1789_v49  ;;  %v1951_v46 = vadd.f32 %v3402_v10, %v3323_v59  ;;  %v3531_v25 = vpop.f32.mrf.mxu0 }
 0x305   : > { %v2142_v17 = vmul.f32 0.5, %v2123_v44  ;;  %v1361_v61 = vpop.f32.mrf.mxu2 }
 0x306   : > { %v2047_v26 = vadd.f32 %v3412_v29, %v1847_v22  ;;  %v1990_v1 = vmul.f32 %v3408_v9, %v1951_v46  ;;  %vm1970_vm13 = vcmp.ge.f32.partialorder %v1951_v46, 0.0  ;;  %v3525_v63 = vpop.f32.mrf.mxu1 }
 0x307   : > { %2161 = vst [vmem:[%s3436_s6 + $0x20] sm:$0xff] %v2142_v17 }
 0x308   : > { %vm2066_vm12 = vcmp.ge.f32.partialorder %v2047_v26, 0.0  ;;  %v2086_v34 = vmul.f32 %v3416_v42, %v2047_v26 }
 0x309   : > { %v1733_v39 = vpop.f32.mrf.mxu3 }
 0x30a   : > { %v2105_v40 = vsel %vm2066_vm12, %v2047_v26, %v2086_v34  ;;  %v1792_v11 = vadd.f32 %v3426_v18, %v1733_v39  ;;  %v2009_v18 = vsel %vm1970_vm13, %v1951_v46, %v1990_v1 }
 0x30b   : > { %v2124_v62 = vadd.f32 %v2105_v40, %v2008_v6 }
 0x30c   : > { %v1850_v51 = vadd.f32 %v3439_v37, %v1792_v11  ;;  %v1952_v37 = vadd.f32 %v3402_v10, %v3335_v54  ;;  %v3543_v61 = vpop.f32.mrf.mxu0 }
 0x30d   : > { %v2143_v48 = vmul.f32 0.5, %v2124_v62 }
 0x30e   : > { %v2048_v12 = vadd.f32 %v3412_v29, %v1850_v51  ;;  %v1991_v35 = vmul.f32 %v3408_v9, %v1952_v37  ;;  %vm1971_vm15 = vcmp.ge.f32.partialorder %v1952_v37, 0.0  ;;  %v3537_v8 = vpop.f32.mrf.mxu1 }
 0x30f   : > { %2162 = vst [vmem:[%s3436_s6 + $0x28] sm:$0xff] %v2143_v48 }
 0x310   : > { %vm2067_vm14 = vcmp.ge.f32.partialorder %v2048_v12, 0.0  ;;  %v2087_v5 = vmul.f32 %v3416_v42, %v2048_v12 }
 0x311   : > { %v1735_v59 = vpop.f32.mrf.mxu3 }
 0x312   : > { %v2106_v55 = vsel %vm2067_vm14, %v2048_v12, %v2087_v5  ;;  %v1794_v16 = vadd.f32 %v3447_v52, %v1735_v59  ;;  %v2010_v52 = vsel %vm1971_vm15, %v1952_v37, %v1991_v35 }
 0x313   : > { %v2125_v24 = vadd.f32 %v2106_v55, %v2009_v18 }
 0x314   : > { %v1852_v31 = vadd.f32 %v3455_v43, %v1794_v16  ;;  %v1953_v43 = vadd.f32 %v3402_v10, %v3341_v38  ;;  %v3555_v51 = vpop.f32.mrf.mxu0 }
 0x315   : > { %v2144_v2 = vmul.f32 0.5, %v2125_v24 }
 0x316   : > { %v2049_v36 = vadd.f32 %v3412_v29, %v1852_v31  ;;  %v1992_v44 = vmul.f32 %v3408_v9, %v1953_v43  ;;  %vm1972_vm1 = vcmp.ge.f32.partialorder %v1953_v43, 0.0  ;;  %v3549_v6 = vpop.f32.mrf.mxu1 }
 0x317   : > { %2163 = vst [vmem:[%s3436_s6 + $0x30] sm:$0xff] %v2144_v2 }
 0x318   : > { %vm2068_vm0 = vcmp.ge.f32.partialorder %v2049_v36, 0.0  ;;  %v2088_v53 = vmul.f32 %v3416_v42, %v2049_v36 }
 0x319   : > { %v1738_v54 = vpop.f32.mrf.mxu3 }
 0x31a   : > { %v2107_v41 = vsel %vm2068_vm0, %v2049_v36, %v2088_v53  ;;  %v1797_v23 = vadd.f32 %v3463_v60, %v1738_v54  ;;  %v2011_v60 = vsel %vm1972_vm1, %v1953_v43, %v1992_v44 }
 0x31b   : > { %v2126_v15 = vadd.f32 %v2107_v41, %v2010_v52 }
 0x31c   : > { %v1855_v21 = vadd.f32 %v3471_v32, %v1797_v23  ;;  %v1954_v32 = vadd.f32 %v3402_v10, %v3353_v13  ;;  %v3567_v24 = vpop.f32.mrf.mxu0 }
 0x31d   : > { %v2145_v49 = vmul.f32 0.5, %v2126_v15 }
 0x31e   : > { %v2050_v22 = vadd.f32 %v3412_v29, %v1855_v21  ;;  %v1993_v40 = vmul.f32 %v3408_v9, %v1954_v32  ;;  %vm1973_vm3 = vcmp.ge.f32.partialorder %v1954_v32, 0.0  ;;  %v3561_v59 = vpop.f32.mrf.mxu1 }
 0x31f   : > { %2164 = vst [vmem:[%s3436_s6 + $0x38] sm:$0xff] %v2145_v49 }
 0x320   : > { %vm2069_vm2 = vcmp.ge.f32.partialorder %v2050_v22, 0.0  ;;  %v2089_v17 = vmul.f32 %v3416_v42, %v2050_v22 }
 0x321   : > { %v1740_v38 = vpop.f32.mrf.mxu3 }
 0x322   : > { %v2108_v19 = vsel %vm2069_vm2, %v2050_v22, %v2089_v17  ;;  %v1799_v26 = vadd.f32 %v3479_v7, %v1740_v38  ;;  %v2012_v7 = vsel %vm1973_vm3, %v1954_v32, %v1993_v40 }
 0x323   : > { %v2127_v34 = vadd.f32 %v2108_v19, %v2011_v60 }
 0x324   : > { %v1857_v39 = vadd.f32 %v3487_v28, %v1799_v26  ;;  %v1955_v28 = vadd.f32 %v3402_v10, %v3364_v45  ;;  %v3579_v23 = vpop.f32.mrf.mxu0 }
 0x325   : > { %v2146_v46 = vmul.f32 0.5, %v2127_v34 }
 0x326   : > { %v2051_v11 = vadd.f32 %v3412_v29, %v1857_v39  ;;  %v1994_v37 = vmul.f32 %v3408_v9, %v1955_v28  ;;  %vm1974_vm5 = vcmp.ge.f32.partialorder %v1955_v28, 0.0  ;;  %v3573_v53 = vpop.f32.mrf.mxu1 }
 0x327   : > { %2165 = vst [vmem:[%s3436_s6 + $0x40] sm:$0xff] %v2146_v46 }
 0x328   : > { %vm2070_vm4 = vcmp.ge.f32.partialorder %v2051_v11, 0.0  ;;  %v2090_v62 = vmul.f32 %v3416_v42, %v2051_v11 }
 0x329   : > { %v1743_v13 = vpop.f32.mrf.mxu3 }
 0x32a   : > { %v2109_v48 = vsel %vm2070_vm4, %v2051_v11, %v2090_v62  ;;  %v1802_v1 = vadd.f32 %v3495_v14, %v1743_v13  ;;  %v2013_v14 = vsel %vm1974_vm5, %v1955_v28, %v1994_v37  ;;  %v1959_v28 = vadd.f32 %v3402_v10, %v3422_v57 }
 0x32b   : > { %v2128_v12 = vadd.f32 %v2109_v48, %v2012_v7 }
 0x32c   : > { %v1860_v5 = vadd.f32 %v3501_v30, %v1802_v1  ;;  %v1956_v30 = vadd.f32 %v3402_v10, %v3378_v47  ;;  %v3594_v34 = vpop.f32.mrf.mxu0  ;;  %vm1978_vm13 = vcmp.ge.f32.partialorder %v1959_v28, 0.0 }
 0x32d   : > { %v2147_v18 = vmul.f32 0.5, %v2128_v12 }
 0x32e   : > { %v2052_v55 = vadd.f32 %v3412_v29, %v1860_v5  ;;  %v1995_v52 = vmul.f32 %v3408_v9, %v1956_v30  ;;  %vm1975_vm7 = vcmp.ge.f32.partialorder %v1956_v30, 0.0  ;;  %v3585_v22 = vpop.f32.mrf.mxu1 }
 0x32f   : > { %2166 = vst [vmem:[%s3436_s6 + $0x48] sm:$0xff] %v2147_v18 }
 0x330   : > { %vm2071_vm6 = vcmp.ge.f32.partialorder %v2052_v55, 0.0  ;;  %v2091_v16 = vmul.f32 %v3416_v42, %v2052_v55 }
 0x331   : > { %v1745_v45 = vpop.f32.mrf.mxu3 }
 0x332   : > { %v2110_v31 = vsel %vm2071_vm6, %v2052_v55, %v2091_v16  ;;  %v1804_v2 = vadd.f32 %v3507_v56, %v1745_v45  ;;  %v2014_v56 = vsel %vm1975_vm7, %v1956_v30, %v1995_v52  ;;  %v1998_v55 = vmul.f32 %v3408_v9, %v1959_v28 }
 0x333   : > { %v2129_v35 = vadd.f32 %v2110_v31, %v2013_v14 }
 0x334   : > { %v1862_v36 = vadd.f32 %v3513_v4, %v1804_v2  ;;  %v1957_v4 = vadd.f32 %v3402_v10, %v3389_v33  ;;  %v1823_v1 = vpop.f32.mrf.mxu0  ;;  %v2017_v14 = vsel %vm1978_vm13, %v1959_v28, %v1998_v55 }
 0x335   : > { %v2148_v54 = vmul.f32 0.5, %v2129_v35 }
 0x336   : > { %v2053_v43 = vadd.f32 %v3412_v29, %v1862_v36  ;;  %v1996_v38 = vmul.f32 %v3408_v9, %v1957_v4  ;;  %vm1976_vm9 = vcmp.ge.f32.partialorder %v1957_v4, 0.0  ;;  %v3597_v40 = vpop.f32.mrf.mxu1 }
 0x337   : > { %2167 = vst [vmem:[%s3436_s6 + $0x50] sm:$0xff] %v2148_v54 }
 0x338   : > { %vm2072_vm8 = vcmp.ge.f32.partialorder %v2053_v43, 0.0  ;;  %v2092_v41 = vmul.f32 %v3416_v42, %v2053_v43  ;;  %v2015_v19 = vsel %vm1976_vm9, %v1957_v4, %v1996_v38 }
 0x339   : > { %v1748_v47 = vpop.f32.mrf.mxu3 }
 0x33a   : > { %v2111_v15 = vsel %vm2072_vm8, %v2053_v43, %v2092_v41  ;;  %v1807_v21 = vadd.f32 %v3519_v20, %v1748_v47  ;;  %v1958_v20 = vadd.f32 %v3402_v10, %v3404_v3 }
 0x33b   : > { %v2130_v49 = vadd.f32 %v2111_v15, %v2014_v56 }
 0x33c   : > { %v1865_v44 = vadd.f32 %v3525_v63, %v1807_v21  ;;  %v1997_v62 = vmul.f32 %v3408_v9, %v1958_v20  ;;  %vm1977_vm11 = vcmp.ge.f32.partialorder %v1958_v20, 0.0 }
 0x33d   : > { %v2149_v17 = vmul.f32 0.5, %v2130_v49 }
 0x33e   : > { %v2054_v60 = vadd.f32 %v3412_v29, %v1865_v44  ;;  %v1881_v18 = vpop.f32.mrf.mxu1 }
 0x33f   : > { %2168 = vst [vmem:[%s3436_s6 + $0x58] sm:$0xff] %v2149_v17 }
 0x340   : > { %vm2073_vm10 = vcmp.ge.f32.partialorder %v2054_v60, 0.0  ;;  %v2093_v32 = vmul.f32 %v3416_v42, %v2054_v60 }
 0x341   : > { %v1750_v33 = vpop.f32.mrf.mxu3 }
 0x342   : > { %v2112_v26 = vsel %vm2073_vm10, %v2054_v60, %v2093_v32  ;;  %v1809_v63 = vadd.f32 %v3531_v25, %v1750_v33  ;;  %v2016_v25 = vsel %vm1977_vm11, %v1958_v20, %v1997_v62 }
 0x343   : > { %v2131_v39 = vadd.f32 %v2112_v26, %v2015_v19 }
 0x344   : > { %v1867_v46 = vadd.f32 %v3537_v8, %v1809_v63 }
 0x345   : > { %v2150_v11 = vmul.f32 0.5, %v2131_v39 }
 0x346   : > { %v2055_v13 = vadd.f32 %v3412_v29, %v1867_v46 }
 0x347   : > { %2169 = vst [vmem:[%s3436_s6 + $0x60] sm:$0xff] %v2150_v11 }
 0x348   : > { %vm2074_vm12 = vcmp.ge.f32.partialorder %v2055_v13, 0.0  ;;  %v2094_v3 = vmul.f32 %v3416_v42, %v2055_v13 }
 0x349   : > { %v1753_v7 = vpop.f32.mrf.mxu3 }
 0x34a   : > { %v2113_v48 = vsel %vm2074_vm12, %v2055_v13, %v2094_v3  ;;  %v1812_v8 = vadd.f32 %v3543_v61, %v1753_v7  ;;  %v1960_v61 = vadd.f32 %v3402_v10, %v3443_v58  ;;  %v1961_v58 = vadd.f32 %v3402_v10, %v3459_v0 }
 0x34b   : > { %v2132_v12 = vadd.f32 %v2113_v48, %v2016_v25  ;;  %v1962_v0 = vadd.f32 %v3402_v10, %v3475_v50  ;;  %v1963_v50 = vadd.f32 %v3402_v10, %v3491_v27 }
 0x34c   : > { %v1870_v5 = vadd.f32 %v3549_v6, %v1812_v8  ;;  %v1999_v36 = vmul.f32 %v3408_v9, %v1960_v61  ;;  %vm1979_vm15 = vcmp.ge.f32.partialorder %v1960_v61, 0.0  ;;  %v2000_v15 = vmul.f32 %v3408_v9, %v1961_v58 }
 0x34d   : > { %v2151_v37 = vmul.f32 0.5, %v2132_v12  ;;  %vm1980_vm1 = vcmp.ge.f32.partialorder %v1961_v58, 0.0  ;;  %v2001_v33 = vmul.f32 %v3408_v9, %v1962_v0  ;;  %vm1981_vm3 = vcmp.ge.f32.partialorder %v1962_v0, 0.0 }
 0x34e   : > { %v2056_v16 = vadd.f32 %v3412_v29, %v1870_v5  ;;  %v2018_v41 = vsel %vm1979_vm15, %v1960_v61, %v1999_v36  ;;  %v2019_v17 = vsel %vm1980_vm1, %v1961_v58, %v2000_v15  ;;  %v2002_v62 = vmul.f32 %v3408_v9, %v1963_v50 }
 0x34f   : > { %2170 = vst [vmem:[%s3436_s6 + $0x68] sm:$0xff] %v2151_v37  ;;  %v2020_v63 = vsel %vm1981_vm3, %v1962_v0, %v2001_v33  ;;  %vm1982_vm5 = vcmp.ge.f32.partialorder %v1963_v50, 0.0 }
 0x350   : > { %vm2075_vm14 = vcmp.ge.f32.partialorder %v2056_v16, 0.0  ;;  %v2095_v45 = vmul.f32 %v3416_v42, %v2056_v16  ;;  %v2021_v25 = vsel %vm1982_vm5, %v1963_v50, %v2002_v62 }
 0x351   : > { %v1755_v57 = vpop.f32.mrf.mxu3 }
 0x352   : > { %v2114_v30 = vsel %vm2075_vm14, %v2056_v16, %v2095_v45  ;;  %v1814_v6 = vadd.f32 %v3555_v51, %v1755_v57 }
 0x353   : > { %v2133_v31 = vadd.f32 %v2114_v30, %v2017_v14 }
 0x354   : > { %v1872_v2 = vadd.f32 %v3561_v59, %v1814_v6 }
 0x355   : > { %v2152_v35 = vmul.f32 0.5, %v2133_v31 }
 0x356   : > { %v2057_v54 = vadd.f32 %v3412_v29, %v1872_v2 }
 0x357   : > { %2171 = vst [vmem:[%s3436_s6 + $0x70] sm:$0xff] %v2152_v35 }
 0x358   : > { %vm2076_vm0 = vcmp.ge.f32.partialorder %v2057_v54, 0.0  ;;  %v2096_v52 = vmul.f32 %v3416_v42, %v2057_v54 }
 0x359   : > { %v1758_v43 = vpop.f32.mrf.mxu3 }
 0x35a   : > { %v2115_v51 = vsel %vm2076_vm0, %v2057_v54, %v2096_v52  ;;  %v1817_v47 = vadd.f32 %v3567_v24, %v1758_v43 }
 0x35b   : > { %v2134_v59 = vadd.f32 %v2115_v51, %v2018_v41 }
 0x35c   : > { %v1875_v56 = vadd.f32 %v3573_v53, %v1817_v47 }
 0x35d   : > { %v2153_v4 = vmul.f32 0.5, %v2134_v59 }
 0x35e   : > { %v2058_v21 = vadd.f32 %v3412_v29, %v1875_v56 }
 0x35f   : > { %2172 = vst [vmem:[%s3436_s6 + $0x78] sm:$0xff] %v2153_v4 }
 0x360   : > { %vm2077_vm2 = vcmp.ge.f32.partialorder %v2058_v21, 0.0  ;;  %v2097_v49 = vmul.f32 %v3416_v42, %v2058_v21 }
 0x361   : > { %v1760_v44 = vpop.f32.mrf.mxu3 }
 0x362   : > { %v2116_v24 = vsel %vm2077_vm2, %v2058_v21, %v2097_v49  ;;  %v1819_v38 = vadd.f32 %v3579_v23, %v1760_v44 }
 0x363   : > { %v2135_v53 = vadd.f32 %v2116_v24, %v2019_v17 }
 0x364   : > { %v1877_v60 = vadd.f32 %v3585_v22, %v1819_v38 }
 0x365   : > { %v2154_v32 = vmul.f32 0.5, %v2135_v53 }
 0x366   : > { %v2059_v19 = vadd.f32 %v3412_v29, %v1877_v60 }
 0x367   : > { %2173 = vst [vmem:[%s3436_s6 + $0x80] sm:$0xff] %v2154_v32 }
 0x368   : > { %vm2078_vm4 = vcmp.ge.f32.partialorder %v2059_v19, 0.0  ;;  %v2098_v20 = vmul.f32 %v3416_v42, %v2059_v19 }
 0x369   : > { %v1763_v26 = vpop.f32.mrf.mxu3 }
 0x36a   : > { %v2117_v23 = vsel %vm2078_vm4, %v2059_v19, %v2098_v20  ;;  %v1822_v22 = vadd.f32 %v3594_v34, %v1763_v26 }
 0x36b   : > { %v2136_v39 = vadd.f32 %v2117_v23, %v2020_v63 }
 0x36c   : > { %v1880_v46 = vadd.f32 %v3597_v40, %v1822_v22 }
 0x36d   : > { %v2155_v11 = vmul.f32 0.5, %v2136_v39 }
 0x36e   : > { %v2060_v13 = vadd.f32 %v3412_v29, %v1880_v46 }
 0x36f   : > { %2174 = vst [vmem:[%s3436_s6 + $0x88] sm:$0xff] %v2155_v11 }
 0x370   : > { %vm2079_vm6 = vcmp.ge.f32.partialorder %v2060_v13, 0.0  ;;  %v2099_v3 = vmul.f32 %v3416_v42, %v2060_v13 }
 0x371   : > { %v1765_v7 = vpop.f32.mrf.mxu3 }
 0x372   : > { %v2118_v10 = vsel %vm2079_vm6, %v2060_v13, %v2099_v3 }
 0x373   : > { %v2137_v27 = vadd.f32 %v2118_v10, %v2021_v25 }
 0x375   : > { %v2156_v28 = vmul.f32 0.5, %v2137_v27 }
 0x377   : > { %2175 = vst [vmem:[%s3436_s6 + $0x90] sm:$0xff] %v2156_v28 }
 0x378 PF: > { %s15_s20 = sadd.s32 1, %s2805_s20   ;;  %s3659_s18 = smov %s2801_s19 }
 0x379   : > { %p12_p5 = scmp.ge.s32.totalorder %s15_s20, 4   ;;  %s3660_s19 = smov %s3662_s21 }
 0x37b   :  { %14 = sbr.rel (!%p12_p5) target bundleno = 2 (0x2), region = 82 }

</bundles_post_ra>
